<compile_context>
chip_gen: v6e
topology: v6e:2x2x1
jax: 0.10.0
libtpu: 0.0.40
codegen_flags: <defaults>
</compile_context>

<pallas_src>
import functools

import jax
import jax.numpy as jnp
from jax.experimental import pallas as pl
from jax.experimental.pallas import tpu as pltpu

LANE = 128


def _round_up(n, m):
    return ((n + m - 1) // m) * m


def decoder_kernel(tok_ref, emb_ref, h0_ref, wih_ref, bih_ref, whh_ref, bhh_ref,
                   wout_ref, bout_ref, logp_ref, h_ref, gx_ref, hs_ref,
                   *, hp, op, vocab, seq, seq_pad):
    """Whole teacher-forced decode in one kernel invocation:
    batched embed/ReLU/x-projection -> serial GRU recurrence -> batched Linear+LogSoftmax."""
    f32 = jnp.float32

    # ---- batched pre-work (not on the recurrent critical path) -----------------
    # Exact embedding gather for all steps: one-hot(tokens) @ emb_table (MXU).
    lane_ids = jax.lax.broadcasted_iota(jnp.int32, (seq_pad, op), 1)
    onehot = (lane_ids == tok_ref[...]).astype(f32)                    # (S_pad, OP)
    x = jnp.dot(onehot, emb_ref[...], preferred_element_type=f32)      # (S_pad, HP)
    x = jnp.maximum(x, 0.0)                                            # F.relu
    # Input projection for every step in one MXU call.
    gx_ref[...] = jnp.dot(x, wih_ref[...], preferred_element_type=f32) + bih_ref[...]

    # Zero the hidden-state stash so padded step rows stay finite in the epilogue.
    hs_ref[...] = jnp.zeros_like(hs_ref)

    whh = whh_ref[...]                                                 # loop-invariant loads
    bhh = bhh_ref[...]

    # ---- serial recurrence: only the h-dependent projection + gate math --------
    def step(s, h):
        gi = gx_ref[pl.ds(s, 1), :]                                    # (1, 3HP)
        gh = jnp.dot(h, whh, preferred_element_type=f32) + bhh         # (1, 3HP)
        r = jax.nn.sigmoid(gi[:, 0:hp] + gh[:, 0:hp])
        z = jax.nn.sigmoid(gi[:, hp:2 * hp] + gh[:, hp:2 * hp])
        n = jnp.tanh(gi[:, 2 * hp:3 * hp] + r * gh[:, 2 * hp:3 * hp])
        h_new = (1.0 - z) * n + z * h                                  # (1, HP)
        hs_ref[pl.ds(s, 1), :] = h_new
        return h_new

    h_final = jax.lax.fori_loop(0, seq, step, h0_ref[...], unroll=True)
    h_ref[...] = h_final

    # ---- batched epilogue: output Linear + masked, stable log-softmax ----------
    logits = jnp.dot(hs_ref[...], wout_ref[...],
                     preferred_element_type=f32) + bout_ref[...]       # (S_pad, OP)
    lane = jax.lax.broadcasted_iota(jnp.int32, logits.shape, 1)
    logits = jnp.where(lane < vocab, logits, -1e30)                    # mask padded vocab lanes
    m = jnp.max(logits, axis=1, keepdims=True)
    shifted = logits - m
    lse = jnp.log(jnp.sum(jnp.exp(shifted), axis=1, keepdims=True))
    logp_ref[...] = shifted - lse


def pad_params(params):
    """Build lane-dense (128-padded) parameter layouts once, outside the decode loop.

    NOTE: all padded rows/cols/lanes MUST stay zero.  Padded hidden lanes remain exactly
    zero through the GRU recurrence only because the padded parts of W_ih^T/W_hh^T,
    b_ih/b_hh and h0 are zero (and W_out's padded rows are zero so they cannot leak)."""
    H, O = params["hidden_size"], params["output_size"]
    HP, OP = _round_up(H, LANE), _round_up(O, LANE)
    f32 = jnp.float32

    emb = jnp.zeros((OP, HP), f32).at[:O, :H].set(params["embedding"].astype(f32))

    wih = jnp.zeros((HP, 3 * HP), f32)
    whh = jnp.zeros((HP, 3 * HP), f32)
    bih = jnp.zeros((1, 3 * HP), f32)
    bhh = jnp.zeros((1, 3 * HP), f32)
    for g in range(3):   # gate g occupies cols [g*HP, g*HP + H)
        wih = wih.at[:H, g * HP:g * HP + H].set(params["w_ih_t"][:, g * H:(g + 1) * H])
        whh = whh.at[:H, g * HP:g * HP + H].set(params["w_hh_t"][:, g * H:(g + 1) * H])
        bih = bih.at[:, g * HP:g * HP + H].set(params["b_ih"][:, g * H:(g + 1) * H])
        bhh = bhh.at[:, g * HP:g * HP + H].set(params["b_hh"][:, g * H:(g + 1) * H])

    wout = jnp.zeros((HP, OP), f32).at[:H, :O].set(params["w_out_t"])
    bout = jnp.zeros((1, OP), f32).at[:, :O].set(params["b_out"])

    return {"H": H, "O": O, "HP": HP, "OP": OP, "emb": emb, "wih": wih, "bih": bih,
            "whh": whh, "bhh": bhh, "wout": wout, "bout": bout}


def decoder_rnn_decode(tokens, hidden, params, padded=None):
    """Run DecoderRNN.forward() once per token in `tokens` (teacher forcing) inside a
    single pallas_call; the step loop runs in-kernel and hidden state stays in vregs.

    tokens: (S,) int32 (ids must be < output_size); hidden: (1, 1, H) f32.
    Returns (log-probs (S, O), final hidden (1, 1, H))."""
    if padded is None:
        padded = pad_params(params)
    H, O, HP, OP = padded["H"], padded["O"], padded["HP"], padded["OP"]
    S = int(tokens.shape[0])
    SP = _round_up(max(S, 1), 8)                     # sublane-align the step axis

    tok_col = jnp.zeros((SP, 1), jnp.int32).at[:S, 0].set(tokens.astype(jnp.int32))
    h0 = jnp.zeros((1, HP), jnp.float32).at[:, :H].set(
        hidden.reshape(1, H).astype(jnp.float32))

    kernel = functools.partial(decoder_kernel, hp=HP, op=OP, vocab=O, seq=S, seq_pad=SP)

    def full(shape):                                 # whole-array VMEM-resident block
        return pl.BlockSpec(shape, lambda i: (0, 0))

    logp_p, h_p = pl.pallas_call(
        kernel,
        out_shape=(
            jax.ShapeDtypeStruct((SP, OP), jnp.float32),
            jax.ShapeDtypeStruct((1, HP), jnp.float32),
        ),
        grid=(1,),
        in_specs=[
            full((SP, 1)),            # token ids
            full((OP, HP)),           # embedding table
            full((1, HP)),            # initial hidden
            full((HP, 3 * HP)),       # W_ih^T (gate-blocked)
            full((1, 3 * HP)),        # b_ih
            full((HP, 3 * HP)),       # W_hh^T (gate-blocked)
            full((1, 3 * HP)),        # b_hh
            full((HP, OP)),           # W_out^T
            full((1, OP)),            # b_out
        ],
        out_specs=(
            full((SP, OP)),           # log-prob slab (single lane-dense write)
            full((1, HP)),            # final hidden
        ),
        scratch_shapes=[
            pltpu.VMEM((SP, 3 * HP), jnp.float32),   # Xg = X @ W_ih^T + b_ih (all steps)
            pltpu.VMEM((SP, HP), jnp.float32),       # per-step hidden states
        ],
        compiler_params=pltpu.CompilerParams(dimension_semantics=("arbitrary",)),
    )(tok_col, padded["emb"], h0, padded["wih"], padded["bih"],
      padded["whh"], padded["bhh"], padded["wout"], padded["bout"])

    return logp_p[:S, :O], h_p[:, :H].reshape(1, 1, H)


def decoder_rnn_forward(token, hidden, params, padded=None):
    """Exact DecoderRNN.forward signature: single token, returns ((1,O) log-probs, (1,1,H))."""
    return decoder_rnn_decode(jnp.reshape(token, (1,)).astype(jnp.int32),
                              hidden, params, padded)


def init_params(key, hidden_size, output_size):
    """Deterministic synthetic parameters matching the PyTorch module shapes."""
    ks = jax.random.split(key, 7)
    H, O = hidden_size, output_size
    s = 1.0 / jnp.sqrt(H)
    return {
        "hidden_size": H,
        "output_size": O,
        # nn.Embedding(output_size, hidden_size)
        "embedding": jax.random.normal(ks[0], (O, H), jnp.float32),
        # nn.GRU(H, H): weight_ih_l0 (3H, H), weight_hh_l0 (3H, H) -> stored transposed
        "w_ih_t": jax.random.uniform(ks[1], (H, 3 * H), jnp.float32, -s, s),
        "w_hh_t": jax.random.uniform(ks[2], (H, 3 * H), jnp.float32, -s, s),
        "b_ih": jax.random.uniform(ks[3], (1, 3 * H), jnp.float32, -s, s),
        "b_hh": jax.random.uniform(ks[4], (1, 3 * H), jnp.float32, -s, s),
        # nn.Linear(H, O): weight (O, H) -> stored transposed (H, O)
        "w_out_t": jax.random.uniform(ks[5], (H, O), jnp.float32, -s, s),
        "b_out": jax.random.uniform(ks[6], (1, O), jnp.float32, -s, s),
    }


def reference_forward(token, hidden, params):
    """Pure-JAX single-step reference replicating the PyTorch forward."""
    H = params["hidden_size"]
    x = jnp.maximum(params["embedding"][token].reshape(1, H), 0.0)
    h = hidden.reshape(1, H)
    gi = x @ params["w_ih_t"] + params["b_ih"]
    gh = h @ params["w_hh_t"] + params["b_hh"]
    r = jax.nn.sigmoid(gi[:, :H] + gh[:, :H])
    z = jax.nn.sigmoid(gi[:, H:2 * H] + gh[:, H:2 * H])
    n = jnp.tanh(gi[:, 2 * H:] + r * gh[:, 2 * H:])
    h_new = (1.0 - z) * n + z * h
    logits = h_new @ params["w_out_t"] + params["b_out"]
    return jax.nn.log_softmax(logits, axis=1), h_new.reshape(1, 1, H)


def reference_decode(tokens, hidden, params):
    logps, h = [], hidden
    for i in range(tokens.shape[0]):
        lp, h = reference_forward(tokens[i], h, params)
        logps.append(lp)
    return jnp.concatenate(logps, axis=0), h


if __name__ == "__main__":
    HIDDEN, OUTPUT, SEQ = 32, 64, 8

    key = jax.random.PRNGKey(0)
    pkey, tkey = jax.random.split(key)
    params = init_params(pkey, HIDDEN, OUTPUT)
    padded = pad_params(params)

    tokens = jax.random.randint(tkey, (SEQ,), 0, OUTPUT, dtype=jnp.int32)
    hidden0 = jnp.zeros((1, 1, HIDDEN), jnp.float32)                 # initHidden()

    # Whole teacher-forced sequence in ONE pallas_call (step loop inside the kernel).
    logp, h_last = decoder_rnn_decode(tokens, hidden0, params, padded)
    logp = jax.block_until_ready(logp)
    h_last = jax.block_until_ready(h_last)

    ref_logp, ref_h = reference_decode(tokens, hidden0, params)
    assert logp.shape == (SEQ, OUTPUT) and h_last.shape == (1, 1, HIDDEN)
    assert jnp.allclose(logp, ref_logp, atol=1e-4, rtol=1e-4)
    assert jnp.allclose(h_last, ref_h, atol=1e-4, rtol=1e-4)

    # Single-step call with the original module's forward signature.
    logp1, h1 = decoder_rnn_forward(tokens[0], hidden0, params, padded)
    logp1 = jax.block_until_ready(logp1)
    ref_logp1, ref_h1 = reference_forward(tokens[0], hidden0, params)
    assert logp1.shape == (1, OUTPUT) and h1.shape == (1, 1, HIDDEN)
    assert jnp.allclose(logp1, ref_logp1, atol=1e-4, rtol=1e-4)
    assert jnp.allclose(h1, ref_h1, atol=1e-4, rtol=1e-4)

    print("KERNEL_OK")
</pallas_src>

<mosaic_0001>
module attributes {stable_mosaic.version = 11 : i64} {
  func.func @decoder_kernel(%arg0: i32, %arg1: memref<8x1xi32, #tpu.memory_space<vmem>>, %arg2: memref<128x128xf32, #tpu.memory_space<vmem>>, %arg3: memref<1x128xf32, #tpu.memory_space<vmem>>, %arg4: memref<128x384xf32, #tpu.memory_space<vmem>>, %arg5: memref<1x384xf32, #tpu.memory_space<vmem>>, %arg6: memref<128x384xf32, #tpu.memory_space<vmem>>, %arg7: memref<1x384xf32, #tpu.memory_space<vmem>>, %arg8: memref<128x128xf32, #tpu.memory_space<vmem>>, %arg9: memref<1x128xf32, #tpu.memory_space<vmem>>, %arg10: memref<8x128xf32, #tpu.memory_space<vmem>>, %arg11: memref<1x128xf32, #tpu.memory_space<vmem>>, %arg12: memref<8x384xf32, #tpu.memory_space<vmem>>, %arg13: memref<8x128xf32, #tpu.memory_space<vmem>>) attributes {dimension_semantics = [#tpu.dimension_semantics<arbitrary>], iteration_bounds = array<i64: 1>, scalar_prefetch = 0 : i64, scratch_operands = 2 : i64, tpu.core_type = #tpu.core_type<tc>, window_params = [{pipeline_mode = #tpu.pipeline_mode<synchronous>, transform_indices = @transform_0, window_bounds = array<i64: 8, 1>}, {pipeline_mode = #tpu.pipeline_mode<synchronous>, transform_indices = @transform_1, window_bounds = array<i64: 128, 128>}, {pipeline_mode = #tpu.pipeline_mode<synchronous>, transform_indices = @transform_2, window_bounds = array<i64: 1, 128>}, {pipeline_mode = #tpu.pipeline_mode<synchronous>, transform_indices = @transform_3, window_bounds = array<i64: 128, 384>}, {pipeline_mode = #tpu.pipeline_mode<synchronous>, transform_indices = @transform_4, window_bounds = array<i64: 1, 384>}, {pipeline_mode = #tpu.pipeline_mode<synchronous>, transform_indices = @transform_5, window_bounds = array<i64: 128, 384>}, {pipeline_mode = #tpu.pipeline_mode<synchronous>, transform_indices = @transform_6, window_bounds = array<i64: 1, 384>}, {pipeline_mode = #tpu.pipeline_mode<synchronous>, transform_indices = @transform_7, window_bounds = array<i64: 128, 128>}, {pipeline_mode = #tpu.pipeline_mode<synchronous>, transform_indices = @transform_8, window_bounds = array<i64: 1, 128>}, {pipeline_mode = #tpu.pipeline_mode<synchronous>, transform_indices = @transform_9, window_bounds = array<i64: 8, 128>}, {pipeline_mode = #tpu.pipeline_mode<synchronous>, transform_indices = @transform_10, window_bounds = array<i64: 1, 128>}]} {
    %0 = tpu.iota {dimensions = array<i32: 1>} : vector<8x128xi32>
    %c0 = arith.constant 0 : index
    %c0_0 = arith.constant 0 : index
    %1 = vector.load %arg1[%c0, %c0_0] : memref<8x1xi32, #tpu.memory_space<vmem>>, vector<8x1xi32>
    %2 = vector.broadcast %1 : vector<8x1xi32> to vector<8x128xi32>
    %3 = arith.cmpi eq, %0, %2 : vector<8x128xi32>
    %4 = arith.extui %3 : vector<8x128xi1> to vector<8x128xi32>
    %5 = arith.sitofp %4 : vector<8x128xi32> to vector<8x128xf32>
    %c0_1 = arith.constant 0 : index
    %c0_2 = arith.constant 0 : index
    %6 = vector.load %arg2[%c0_1, %c0_2] : memref<128x128xf32, #tpu.memory_space<vmem>>, vector<128x128xf32>
    %cst = arith.constant dense<0.000000e+00> : vector<8x128xf32>
    %7 = tpu.matmul %5, %6, %cst {dimension_numbers = #tpu.dot_dimension_numbers<[1], [0], [0], [1], [0, 0, 1, 1], [], []>} : vector<8x128xf32>, vector<128x128xf32>, vector<8x128xf32> -> vector<8x128xf32>
    %cst_3 = arith.constant 0.000000e+00 : f32
    %8 = vector.broadcast %cst_3 : f32 to vector<8x128xf32>
    %9 = arith.maximumf %7, %8 : vector<8x128xf32>
    %c0_4 = arith.constant 0 : index
    %c0_5 = arith.constant 0 : index
    %10 = vector.load %arg4[%c0_4, %c0_5] : memref<128x384xf32, #tpu.memory_space<vmem>>, vector<128x384xf32>
    %cst_6 = arith.constant dense<0.000000e+00> : vector<8x384xf32>
    %11 = tpu.matmul %9, %10, %cst_6 {dimension_numbers = #tpu.dot_dimension_numbers<[1], [0], [0], [1], [0, 0, 1, 1], [], []>} : vector<8x128xf32>, vector<128x384xf32>, vector<8x384xf32> -> vector<8x384xf32>
    %c0_7 = arith.constant 0 : index
    %c0_8 = arith.constant 0 : index
    %12 = vector.load %arg5[%c0_7, %c0_8] : memref<1x384xf32, #tpu.memory_space<vmem>>, vector<1x384xf32>
    %13 = vector.broadcast %12 : vector<1x384xf32> to vector<8x384xf32>
    %14 = arith.addf %11, %13 : vector<8x384xf32>
    %c0_9 = arith.constant 0 : index
    %c0_10 = arith.constant 0 : index
    %15 = vector.load %arg12[%c0_9, %c0_10] : memref<8x384xf32, #tpu.memory_space<vmem>>, vector<8x384xf32>
    tpu.vector_store %arg12[%c0_9, %c0_10], %14 {strides = array<i32>} : memref<8x384xf32, #tpu.memory_space<vmem>>, vector<8x384xf32>,
    %cst_11 = arith.constant 0.000000e+00 : f32
    %16 = vector.broadcast %cst_11 : f32 to vector<8x128xf32>
    %c0_12 = arith.constant 0 : index
    %c0_13 = arith.constant 0 : index
    %17 = vector.load %arg13[%c0_12, %c0_13] : memref<8x128xf32, #tpu.memory_space<vmem>>, vector<8x128xf32>
    tpu.vector_store %arg13[%c0_12, %c0_13], %16 {strides = array<i32>} : memref<8x128xf32, #tpu.memory_space<vmem>>, vector<8x128xf32>,
    %c0_14 = arith.constant 0 : index
    %c0_15 = arith.constant 0 : index
    %18 = vector.load %arg6[%c0_14, %c0_15] : memref<128x384xf32, #tpu.memory_space<vmem>>, vector<128x384xf32>
    %c0_16 = arith.constant 0 : index
    %c0_17 = arith.constant 0 : index
    %19 = vector.load %arg7[%c0_16, %c0_17] : memref<1x384xf32, #tpu.memory_space<vmem>>, vector<1x384xf32>
    %c0_18 = arith.constant 0 : index
    %c0_19 = arith.constant 0 : index
    %20 = vector.load %arg3[%c0_18, %c0_19] : memref<1x128xf32, #tpu.memory_space<vmem>>, vector<1x128xf32>
    %c0_i32 = arith.constant 0 : i32
    %21 = arith.index_cast %c0_i32 : i32 to index
    %c0_20 = arith.constant 0 : index
    %22 = vector.load %arg12[%21, %c0_20] : memref<8x384xf32, #tpu.memory_space<vmem>>, vector<1x384xf32>
    %cst_21 = arith.constant dense<0.000000e+00> : vector<1x384xf32>
    %23 = tpu.matmul %20, %18, %cst_21 {dimension_numbers = #tpu.dot_dimension_numbers<[1], [0], [0], [1], [0, 0, 1, 1], [], []>} : vector<1x128xf32>, vector<128x384xf32>, vector<1x384xf32> -> vector<1x384xf32>
    %24 = arith.addf %23, %19 : vector<1x384xf32>
    %25 = vector.extract_strided_slice %22 {offsets = [0, 0], sizes = [1, 128], strides = [1, 1]} : vector<1x384xf32> to vector<1x128xf32>
    %26 = vector.extract_strided_slice %24 {offsets = [0, 0], sizes = [1, 128], strides = [1, 1]} : vector<1x384xf32> to vector<1x128xf32>
    %27 = arith.addf %25, %26 : vector<1x128xf32>
    %28 = arith.negf %27 : vector<1x128xf32>
    %29 = math.exp %28 : vector<1x128xf32>
    %cst_22 = arith.constant 1.000000e+00 : f32
    %30 = vector.broadcast %cst_22 : f32 to vector<1x128xf32>
    %31 = arith.addf %30, %29 : vector<1x128xf32>
    %32 = arith.divf %30, %31 : vector<1x128xf32>
    %33 = vector.extract_strided_slice %22 {offsets = [0, 128], sizes = [1, 128], strides = [1, 1]} : vector<1x384xf32> to vector<1x128xf32>
    %34 = vector.extract_strided_slice %24 {offsets = [0, 128], sizes = [1, 128], strides = [1, 1]} : vector<1x384xf32> to vector<1x128xf32>
    %35 = arith.addf %33, %34 : vector<1x128xf32>
    %36 = arith.negf %35 : vector<1x128xf32>
    %37 = math.exp %36 : vector<1x128xf32>
    %cst_23 = arith.constant 1.000000e+00 : f32
    %38 = vector.broadcast %cst_23 : f32 to vector<1x128xf32>
    %39 = arith.addf %38, %37 : vector<1x128xf32>
    %40 = arith.divf %38, %39 : vector<1x128xf32>
    %41 = vector.extract_strided_slice %22 {offsets = [0, 256], sizes = [1, 128], strides = [1, 1]} : vector<1x384xf32> to vector<1x128xf32>
    %42 = vector.extract_strided_slice %24 {offsets = [0, 256], sizes = [1, 128], strides = [1, 1]} : vector<1x384xf32> to vector<1x128xf32>
    %43 = arith.mulf %32, %42 : vector<1x128xf32>
    %44 = arith.addf %41, %43 : vector<1x128xf32>
    %45 = math.tanh %44 : vector<1x128xf32>
    %cst_24 = arith.constant 1.000000e+00 : f32
    %46 = vector.broadcast %cst_24 : f32 to vector<1x128xf32>
    %47 = arith.subf %46, %40 : vector<1x128xf32>
    %48 = arith.mulf %47, %45 : vector<1x128xf32>
    %49 = arith.mulf %40, %20 : vector<1x128xf32>
    %50 = arith.addf %48, %49 : vector<1x128xf32>
    %51 = arith.index_cast %c0_i32 : i32 to index
    %c0_25 = arith.constant 0 : index
    %52 = vector.load %arg13[%51, %c0_25] : memref<8x128xf32, #tpu.memory_space<vmem>>, vector<1x128xf32>
    tpu.vector_store %arg13[%51, %c0_25], %50 {strides = array<i32>} : memref<8x128xf32, #tpu.memory_space<vmem>>, vector<1x128xf32>,
    %c1_i32 = arith.constant 1 : i32
    %53 = arith.index_cast %c1_i32 : i32 to index
    %c0_26 = arith.constant 0 : index
    %54 = vector.load %arg12[%53, %c0_26] : memref<8x384xf32, #tpu.memory_space<vmem>>, vector<1x384xf32>
    %cst_27 = arith.constant dense<0.000000e+00> : vector<1x384xf32>
    %55 = tpu.matmul %50, %18, %cst_27 {dimension_numbers = #tpu.dot_dimension_numbers<[1], [0], [0], [1], [0, 0, 1, 1], [], []>} : vector<1x128xf32>, vector<128x384xf32>, vector<1x384xf32> -> vector<1x384xf32>
    %56 = arith.addf %55, %19 : vector<1x384xf32>
    %57 = vector.extract_strided_slice %54 {offsets = [0, 0], sizes = [1, 128], strides = [1, 1]} : vector<1x384xf32> to vector<1x128xf32>
    %58 = vector.extract_strided_slice %56 {offsets = [0, 0], sizes = [1, 128], strides = [1, 1]} : vector<1x384xf32> to vector<1x128xf32>
    %59 = arith.addf %57, %58 : vector<1x128xf32>
    %60 = arith.negf %59 : vector<1x128xf32>
    %61 = math.exp %60 : vector<1x128xf32>
    %cst_28 = arith.constant 1.000000e+00 : f32
    %62 = vector.broadcast %cst_28 : f32 to vector<1x128xf32>
    %63 = arith.addf %62, %61 : vector<1x128xf32>
    %64 = arith.divf %62, %63 : vector<1x128xf32>
    %65 = vector.extract_strided_slice %54 {offsets = [0, 128], sizes = [1, 128], strides = [1, 1]} : vector<1x384xf32> to vector<1x128xf32>
    %66 = vector.extract_strided_slice %56 {offsets = [0, 128], sizes = [1, 128], strides = [1, 1]} : vector<1x384xf32> to vector<1x128xf32>
    %67 = arith.addf %65, %66 : vector<1x128xf32>
    %68 = arith.negf %67 : vector<1x128xf32>
    %69 = math.exp %68 : vector<1x128xf32>
    %cst_29 = arith.constant 1.000000e+00 : f32
    %70 = vector.broadcast %cst_29 : f32 to vector<1x128xf32>
    %71 = arith.addf %70, %69 : vector<1x128xf32>
    %72 = arith.divf %70, %71 : vector<1x128xf32>
    %73 = vector.extract_strided_slice %54 {offsets = [0, 256], sizes = [1, 128], strides = [1, 1]} : vector<1x384xf32> to vector<1x128xf32>
    %74 = vector.extract_strided_slice %56 {offsets = [0, 256], sizes = [1, 128], strides = [1, 1]} : vector<1x384xf32> to vector<1x128xf32>
    %75 = arith.mulf %64, %74 : vector<1x128xf32>
    %76 = arith.addf %73, %75 : vector<1x128xf32>
    %77 = math.tanh %76 : vector<1x128xf32>
    %cst_30 = arith.constant 1.000000e+00 : f32
    %78 = vector.broadcast %cst_30 : f32 to vector<1x128xf32>
    %79 = arith.subf %78, %72 : vector<1x128xf32>
    %80 = arith.mulf %79, %77 : vector<1x128xf32>
    %81 = arith.mulf %72, %50 : vector<1x128xf32>
    %82 = arith.addf %80, %81 : vector<1x128xf32>
    %83 = arith.index_cast %c1_i32 : i32 to index
    %c0_31 = arith.constant 0 : index
    %84 = vector.load %arg13[%83, %c0_31] : memref<8x128xf32, #tpu.memory_space<vmem>>, vector<1x128xf32>
    tpu.vector_store %arg13[%83, %c0_31], %82 {strides = array<i32>} : memref<8x128xf32, #tpu.memory_space<vmem>>, vector<1x128xf32>,
    %c2_i32 = arith.constant 2 : i32
    %85 = arith.index_cast %c2_i32 : i32 to index
    %c0_32 = arith.constant 0 : index
    %86 = vector.load %arg12[%85, %c0_32] : memref<8x384xf32, #tpu.memory_space<vmem>>, vector<1x384xf32>
    %cst_33 = arith.constant dense<0.000000e+00> : vector<1x384xf32>
    %87 = tpu.matmul %82, %18, %cst_33 {dimension_numbers = #tpu.dot_dimension_numbers<[1], [0], [0], [1], [0, 0, 1, 1], [], []>} : vector<1x128xf32>, vector<128x384xf32>, vector<1x384xf32> -> vector<1x384xf32>
    %88 = arith.addf %87, %19 : vector<1x384xf32>
    %89 = vector.extract_strided_slice %86 {offsets = [0, 0], sizes = [1, 128], strides = [1, 1]} : vector<1x384xf32> to vector<1x128xf32>
    %90 = vector.extract_strided_slice %88 {offsets = [0, 0], sizes = [1, 128], strides = [1, 1]} : vector<1x384xf32> to vector<1x128xf32>
    %91 = arith.addf %89, %90 : vector<1x128xf32>
    %92 = arith.negf %91 : vector<1x128xf32>
    %93 = math.exp %92 : vector<1x128xf32>
    %cst_34 = arith.constant 1.000000e+00 : f32
    %94 = vector.broadcast %cst_34 : f32 to vector<1x128xf32>
    %95 = arith.addf %94, %93 : vector<1x128xf32>
    %96 = arith.divf %94, %95 : vector<1x128xf32>
    %97 = vector.extract_strided_slice %86 {offsets = [0, 128], sizes = [1, 128], strides = [1, 1]} : vector<1x384xf32> to vector<1x128xf32>
    %98 = vector.extract_strided_slice %88 {offsets = [0, 128], sizes = [1, 128], strides = [1, 1]} : vector<1x384xf32> to vector<1x128xf32>
    %99 = arith.addf %97, %98 : vector<1x128xf32>
    %100 = arith.negf %99 : vector<1x128xf32>
    %101 = math.exp %100 : vector<1x128xf32>
    %cst_35 = arith.constant 1.000000e+00 : f32
    %102 = vector.broadcast %cst_35 : f32 to vector<1x128xf32>
    %103 = arith.addf %102, %101 : vector<1x128xf32>
    %104 = arith.divf %102, %103 : vector<1x128xf32>
    %105 = vector.extract_strided_slice %86 {offsets = [0, 256], sizes = [1, 128], strides = [1, 1]} : vector<1x384xf32> to vector<1x128xf32>
    %106 = vector.extract_strided_slice %88 {offsets = [0, 256], sizes = [1, 128], strides = [1, 1]} : vector<1x384xf32> to vector<1x128xf32>
    %107 = arith.mulf %96, %106 : vector<1x128xf32>
    %108 = arith.addf %105, %107 : vector<1x128xf32>
    %109 = math.tanh %108 : vector<1x128xf32>
    %cst_36 = arith.constant 1.000000e+00 : f32
    %110 = vector.broadcast %cst_36 : f32 to vector<1x128xf32>
    %111 = arith.subf %110, %104 : vector<1x128xf32>
    %112 = arith.mulf %111, %109 : vector<1x128xf32>
    %113 = arith.mulf %104, %82 : vector<1x128xf32>
    %114 = arith.addf %112, %113 : vector<1x128xf32>
    %115 = arith.index_cast %c2_i32 : i32 to index
    %c0_37 = arith.constant 0 : index
    %116 = vector.load %arg13[%115, %c0_37] : memref<8x128xf32, #tpu.memory_space<vmem>>, vector<1x128xf32>
    tpu.vector_store %arg13[%115, %c0_37], %114 {strides = array<i32>} : memref<8x128xf32, #tpu.memory_space<vmem>>, vector<1x128xf32>,
    %c3_i32 = arith.constant 3 : i32
    %117 = arith.index_cast %c3_i32 : i32 to index
    %c0_38 = arith.constant 0 : index
    %118 = vector.load %arg12[%117, %c0_38] : memref<8x384xf32, #tpu.memory_space<vmem>>, vector<1x384xf32>
    %cst_39 = arith.constant dense<0.000000e+00> : vector<1x384xf32>
    %119 = tpu.matmul %114, %18, %cst_39 {dimension_numbers = #tpu.dot_dimension_numbers<[1], [0], [0], [1], [0, 0, 1, 1], [], []>} : vector<1x128xf32>, vector<128x384xf32>, vector<1x384xf32> -> vector<1x384xf32>
    %120 = arith.addf %119, %19 : vector<1x384xf32>
    %121 = vector.extract_strided_slice %118 {offsets = [0, 0], sizes = [1, 128], strides = [1, 1]} : vector<1x384xf32> to vector<1x128xf32>
    %122 = vector.extract_strided_slice %120 {offsets = [0, 0], sizes = [1, 128], strides = [1, 1]} : vector<1x384xf32> to vector<1x128xf32>
    %123 = arith.addf %121, %122 : vector<1x128xf32>
    %124 = arith.negf %123 : vector<1x128xf32>
    %125 = math.exp %124 : vector<1x128xf32>
    %cst_40 = arith.constant 1.000000e+00 : f32
    %126 = vector.broadcast %cst_40 : f32 to vector<1x128xf32>
    %127 = arith.addf %126, %125 : vector<1x128xf32>
    %128 = arith.divf %126, %127 : vector<1x128xf32>
    %129 = vector.extract_strided_slice %118 {offsets = [0, 128], sizes = [1, 128], strides = [1, 1]} : vector<1x384xf32> to vector<1x128xf32>
    %130 = vector.extract_strided_slice %120 {offsets = [0, 128], sizes = [1, 128], strides = [1, 1]} : vector<1x384xf32> to vector<1x128xf32>
    %131 = arith.addf %129, %130 : vector<1x128xf32>
    %132 = arith.negf %131 : vector<1x128xf32>
    %133 = math.exp %132 : vector<1x128xf32>
    %cst_41 = arith.constant 1.000000e+00 : f32
    %134 = vector.broadcast %cst_41 : f32 to vector<1x128xf32>
    %135 = arith.addf %134, %133 : vector<1x128xf32>
    %136 = arith.divf %134, %135 : vector<1x128xf32>
    %137 = vector.extract_strided_slice %118 {offsets = [0, 256], sizes = [1, 128], strides = [1, 1]} : vector<1x384xf32> to vector<1x128xf32>
    %138 = vector.extract_strided_slice %120 {offsets = [0, 256], sizes = [1, 128], strides = [1, 1]} : vector<1x384xf32> to vector<1x128xf32>
    %139 = arith.mulf %128, %138 : vector<1x128xf32>
    %140 = arith.addf %137, %139 : vector<1x128xf32>
    %141 = math.tanh %140 : vector<1x128xf32>
    %cst_42 = arith.constant 1.000000e+00 : f32
    %142 = vector.broadcast %cst_42 : f32 to vector<1x128xf32>
    %143 = arith.subf %142, %136 : vector<1x128xf32>
    %144 = arith.mulf %143, %141 : vector<1x128xf32>
    %145 = arith.mulf %136, %114 : vector<1x128xf32>
    %146 = arith.addf %144, %145 : vector<1x128xf32>
    %147 = arith.index_cast %c3_i32 : i32 to index
    %c0_43 = arith.constant 0 : index
    %148 = vector.load %arg13[%147, %c0_43] : memref<8x128xf32, #tpu.memory_space<vmem>>, vector<1x128xf32>
    tpu.vector_store %arg13[%147, %c0_43], %146 {strides = array<i32>} : memref<8x128xf32, #tpu.memory_space<vmem>>, vector<1x128xf32>,
    %c4_i32 = arith.constant 4 : i32
    %149 = arith.index_cast %c4_i32 : i32 to index
    %c0_44 = arith.constant 0 : index
    %150 = vector.load %arg12[%149, %c0_44] : memref<8x384xf32, #tpu.memory_space<vmem>>, vector<1x384xf32>
    %cst_45 = arith.constant dense<0.000000e+00> : vector<1x384xf32>
    %151 = tpu.matmul %146, %18, %cst_45 {dimension_numbers = #tpu.dot_dimension_numbers<[1], [0], [0], [1], [0, 0, 1, 1], [], []>} : vector<1x128xf32>, vector<128x384xf32>, vector<1x384xf32> -> vector<1x384xf32>
    %152 = arith.addf %151, %19 : vector<1x384xf32>
    %153 = vector.extract_strided_slice %150 {offsets = [0, 0], sizes = [1, 128], strides = [1, 1]} : vector<1x384xf32> to vector<1x128xf32>
    %154 = vector.extract_strided_slice %152 {offsets = [0, 0], sizes = [1, 128], strides = [1, 1]} : vector<1x384xf32> to vector<1x128xf32>
    %155 = arith.addf %153, %154 : vector<1x128xf32>
    %156 = arith.negf %155 : vector<1x128xf32>
    %157 = math.exp %156 : vector<1x128xf32>
    %cst_46 = arith.constant 1.000000e+00 : f32
    %158 = vector.broadcast %cst_46 : f32 to vector<1x128xf32>
    %159 = arith.addf %158, %157 : vector<1x128xf32>
    %160 = arith.divf %158, %159 : vector<1x128xf32>
    %161 = vector.extract_strided_slice %150 {offsets = [0, 128], sizes = [1, 128], strides = [1, 1]} : vector<1x384xf32> to vector<1x128xf32>
    %162 = vector.extract_strided_slice %152 {offsets = [0, 128], sizes = [1, 128], strides = [1, 1]} : vector<1x384xf32> to vector<1x128xf32>
    %163 = arith.addf %161, %162 : vector<1x128xf32>
    %164 = arith.negf %163 : vector<1x128xf32>
    %165 = math.exp %164 : vector<1x128xf32>
    %cst_47 = arith.constant 1.000000e+00 : f32
    %166 = vector.broadcast %cst_47 : f32 to vector<1x128xf32>
    %167 = arith.addf %166, %165 : vector<1x128xf32>
    %168 = arith.divf %166, %167 : vector<1x128xf32>
    %169 = vector.extract_strided_slice %150 {offsets = [0, 256], sizes = [1, 128], strides = [1, 1]} : vector<1x384xf32> to vector<1x128xf32>
    %170 = vector.extract_strided_slice %152 {offsets = [0, 256], sizes = [1, 128], strides = [1, 1]} : vector<1x384xf32> to vector<1x128xf32>
    %171 = arith.mulf %160, %170 : vector<1x128xf32>
    %172 = arith.addf %169, %171 : vector<1x128xf32>
    %173 = math.tanh %172 : vector<1x128xf32>
    %cst_48 = arith.constant 1.000000e+00 : f32
    %174 = vector.broadcast %cst_48 : f32 to vector<1x128xf32>
    %175 = arith.subf %174, %168 : vector<1x128xf32>
    %176 = arith.mulf %175, %173 : vector<1x128xf32>
    %177 = arith.mulf %168, %146 : vector<1x128xf32>
    %178 = arith.addf %176, %177 : vector<1x128xf32>
    %179 = arith.index_cast %c4_i32 : i32 to index
    %c0_49 = arith.constant 0 : index
    %180 = vector.load %arg13[%179, %c0_49] : memref<8x128xf32, #tpu.memory_space<vmem>>, vector<1x128xf32>
    tpu.vector_store %arg13[%179, %c0_49], %178 {strides = array<i32>} : memref<8x128xf32, #tpu.memory_space<vmem>>, vector<1x128xf32>,
    %c5_i32 = arith.constant 5 : i32
    %181 = arith.index_cast %c5_i32 : i32 to index
    %c0_50 = arith.constant 0 : index
    %182 = vector.load %arg12[%181, %c0_50] : memref<8x384xf32, #tpu.memory_space<vmem>>, vector<1x384xf32>
    %cst_51 = arith.constant dense<0.000000e+00> : vector<1x384xf32>
    %183 = tpu.matmul %178, %18, %cst_51 {dimension_numbers = #tpu.dot_dimension_numbers<[1], [0], [0], [1], [0, 0, 1, 1], [], []>} : vector<1x128xf32>, vector<128x384xf32>, vector<1x384xf32> -> vector<1x384xf32>
    %184 = arith.addf %183, %19 : vector<1x384xf32>
    %185 = vector.extract_strided_slice %182 {offsets = [0, 0], sizes = [1, 128], strides = [1, 1]} : vector<1x384xf32> to vector<1x128xf32>
    %186 = vector.extract_strided_slice %184 {offsets = [0, 0], sizes = [1, 128], strides = [1, 1]} : vector<1x384xf32> to vector<1x128xf32>
    %187 = arith.addf %185, %186 : vector<1x128xf32>
    %188 = arith.negf %187 : vector<1x128xf32>
    %189 = math.exp %188 : vector<1x128xf32>
    %cst_52 = arith.constant 1.000000e+00 : f32
    %190 = vector.broadcast %cst_52 : f32 to vector<1x128xf32>
    %191 = arith.addf %190, %189 : vector<1x128xf32>
    %192 = arith.divf %190, %191 : vector<1x128xf32>
    %193 = vector.extract_strided_slice %182 {offsets = [0, 128], sizes = [1, 128], strides = [1, 1]} : vector<1x384xf32> to vector<1x128xf32>
    %194 = vector.extract_strided_slice %184 {offsets = [0, 128], sizes = [1, 128], strides = [1, 1]} : vector<1x384xf32> to vector<1x128xf32>
    %195 = arith.addf %193, %194 : vector<1x128xf32>
    %196 = arith.negf %195 : vector<1x128xf32>
    %197 = math.exp %196 : vector<1x128xf32>
    %cst_53 = arith.constant 1.000000e+00 : f32
    %198 = vector.broadcast %cst_53 : f32 to vector<1x128xf32>
    %199 = arith.addf %198, %197 : vector<1x128xf32>
    %200 = arith.divf %198, %199 : vector<1x128xf32>
    %201 = vector.extract_strided_slice %182 {offsets = [0, 256], sizes = [1, 128], strides = [1, 1]} : vector<1x384xf32> to vector<1x128xf32>
    %202 = vector.extract_strided_slice %184 {offsets = [0, 256], sizes = [1, 128], strides = [1, 1]} : vector<1x384xf32> to vector<1x128xf32>
    %203 = arith.mulf %192, %202 : vector<1x128xf32>
    %204 = arith.addf %201, %203 : vector<1x128xf32>
    %205 = math.tanh %204 : vector<1x128xf32>
    %cst_54 = arith.constant 1.000000e+00 : f32
    %206 = vector.broadcast %cst_54 : f32 to vector<1x128xf32>
    %207 = arith.subf %206, %200 : vector<1x128xf32>
    %208 = arith.mulf %207, %205 : vector<1x128xf32>
    %209 = arith.mulf %200, %178 : vector<1x128xf32>
    %210 = arith.addf %208, %209 : vector<1x128xf32>
    %211 = arith.index_cast %c5_i32 : i32 to index
    %c0_55 = arith.constant 0 : index
    %212 = vector.load %arg13[%211, %c0_55] : memref<8x128xf32, #tpu.memory_space<vmem>>, vector<1x128xf32>
    tpu.vector_store %arg13[%211, %c0_55], %210 {strides = array<i32>} : memref<8x128xf32, #tpu.memory_space<vmem>>, vector<1x128xf32>,
    %c6_i32 = arith.constant 6 : i32
    %213 = arith.index_cast %c6_i32 : i32 to index
    %c0_56 = arith.constant 0 : index
    %214 = vector.load %arg12[%213, %c0_56] : memref<8x384xf32, #tpu.memory_space<vmem>>, vector<1x384xf32>
    %cst_57 = arith.constant dense<0.000000e+00> : vector<1x384xf32>
    %215 = tpu.matmul %210, %18, %cst_57 {dimension_numbers = #tpu.dot_dimension_numbers<[1], [0], [0], [1], [0, 0, 1, 1], [], []>} : vector<1x128xf32>, vector<128x384xf32>, vector<1x384xf32> -> vector<1x384xf32>
    %216 = arith.addf %215, %19 : vector<1x384xf32>
    %217 = vector.extract_strided_slice %214 {offsets = [0, 0], sizes = [1, 128], strides = [1, 1]} : vector<1x384xf32> to vector<1x128xf32>
    %218 = vector.extract_strided_slice %216 {offsets = [0, 0], sizes = [1, 128], strides = [1, 1]} : vector<1x384xf32> to vector<1x128xf32>
    %219 = arith.addf %217, %218 : vector<1x128xf32>
    %220 = arith.negf %219 : vector<1x128xf32>
    %221 = math.exp %220 : vector<1x128xf32>
    %cst_58 = arith.constant 1.000000e+00 : f32
    %222 = vector.broadcast %cst_58 : f32 to vector<1x128xf32>
    %223 = arith.addf %222, %221 : vector<1x128xf32>
    %224 = arith.divf %222, %223 : vector<1x128xf32>
    %225 = vector.extract_strided_slice %214 {offsets = [0, 128], sizes = [1, 128], strides = [1, 1]} : vector<1x384xf32> to vector<1x128xf32>
    %226 = vector.extract_strided_slice %216 {offsets = [0, 128], sizes = [1, 128], strides = [1, 1]} : vector<1x384xf32> to vector<1x128xf32>
    %227 = arith.addf %225, %226 : vector<1x128xf32>
    %228 = arith.negf %227 : vector<1x128xf32>
    %229 = math.exp %228 : vector<1x128xf32>
    %cst_59 = arith.constant 1.000000e+00 : f32
    %230 = vector.broadcast %cst_59 : f32 to vector<1x128xf32>
    %231 = arith.addf %230, %229 : vector<1x128xf32>
    %232 = arith.divf %230, %231 : vector<1x128xf32>
    %233 = vector.extract_strided_slice %214 {offsets = [0, 256], sizes = [1, 128], strides = [1, 1]} : vector<1x384xf32> to vector<1x128xf32>
    %234 = vector.extract_strided_slice %216 {offsets = [0, 256], sizes = [1, 128], strides = [1, 1]} : vector<1x384xf32> to vector<1x128xf32>
    %235 = arith.mulf %224, %234 : vector<1x128xf32>
    %236 = arith.addf %233, %235 : vector<1x128xf32>
    %237 = math.tanh %236 : vector<1x128xf32>
    %cst_60 = arith.constant 1.000000e+00 : f32
    %238 = vector.broadcast %cst_60 : f32 to vector<1x128xf32>
    %239 = arith.subf %238, %232 : vector<1x128xf32>
    %240 = arith.mulf %239, %237 : vector<1x128xf32>
    %241 = arith.mulf %232, %210 : vector<1x128xf32>
    %242 = arith.addf %240, %241 : vector<1x128xf32>
    %243 = arith.index_cast %c6_i32 : i32 to index
    %c0_61 = arith.constant 0 : index
    %244 = vector.load %arg13[%243, %c0_61] : memref<8x128xf32, #tpu.memory_space<vmem>>, vector<1x128xf32>
    tpu.vector_store %arg13[%243, %c0_61], %242 {strides = array<i32>} : memref<8x128xf32, #tpu.memory_space<vmem>>, vector<1x128xf32>,
    %c7_i32 = arith.constant 7 : i32
    %245 = arith.index_cast %c7_i32 : i32 to index
    %c0_62 = arith.constant 0 : index
    %246 = vector.load %arg12[%245, %c0_62] : memref<8x384xf32, #tpu.memory_space<vmem>>, vector<1x384xf32>
    %cst_63 = arith.constant dense<0.000000e+00> : vector<1x384xf32>
    %247 = tpu.matmul %242, %18, %cst_63 {dimension_numbers = #tpu.dot_dimension_numbers<[1], [0], [0], [1], [0, 0, 1, 1], [], []>} : vector<1x128xf32>, vector<128x384xf32>, vector<1x384xf32> -> vector<1x384xf32>
    %248 = arith.addf %247, %19 : vector<1x384xf32>
    %249 = vector.extract_strided_slice %246 {offsets = [0, 0], sizes = [1, 128], strides = [1, 1]} : vector<1x384xf32> to vector<1x128xf32>
    %250 = vector.extract_strided_slice %248 {offsets = [0, 0], sizes = [1, 128], strides = [1, 1]} : vector<1x384xf32> to vector<1x128xf32>
    %251 = arith.addf %249, %250 : vector<1x128xf32>
    %252 = arith.negf %251 : vector<1x128xf32>
    %253 = math.exp %252 : vector<1x128xf32>
    %cst_64 = arith.constant 1.000000e+00 : f32
    %254 = vector.broadcast %cst_64 : f32 to vector<1x128xf32>
    %255 = arith.addf %254, %253 : vector<1x128xf32>
    %256 = arith.divf %254, %255 : vector<1x128xf32>
    %257 = vector.extract_strided_slice %246 {offsets = [0, 128], sizes = [1, 128], strides = [1, 1]} : vector<1x384xf32> to vector<1x128xf32>
    %258 = vector.extract_strided_slice %248 {offsets = [0, 128], sizes = [1, 128], strides = [1, 1]} : vector<1x384xf32> to vector<1x128xf32>
    %259 = arith.addf %257, %258 : vector<1x128xf32>
    %260 = arith.negf %259 : vector<1x128xf32>
    %261 = math.exp %260 : vector<1x128xf32>
    %cst_65 = arith.constant 1.000000e+00 : f32
    %262 = vector.broadcast %cst_65 : f32 to vector<1x128xf32>
    %263 = arith.addf %262, %261 : vector<1x128xf32>
    %264 = arith.divf %262, %263 : vector<1x128xf32>
    %265 = vector.extract_strided_slice %246 {offsets = [0, 256], sizes = [1, 128], strides = [1, 1]} : vector<1x384xf32> to vector<1x128xf32>
    %266 = vector.extract_strided_slice %248 {offsets = [0, 256], sizes = [1, 128], strides = [1, 1]} : vector<1x384xf32> to vector<1x128xf32>
    %267 = arith.mulf %256, %266 : vector<1x128xf32>
    %268 = arith.addf %265, %267 : vector<1x128xf32>
    %269 = math.tanh %268 : vector<1x128xf32>
    %cst_66 = arith.constant 1.000000e+00 : f32
    %270 = vector.broadcast %cst_66 : f32 to vector<1x128xf32>
    %271 = arith.subf %270, %264 : vector<1x128xf32>
    %272 = arith.mulf %271, %269 : vector<1x128xf32>
    %273 = arith.mulf %264, %242 : vector<1x128xf32>
    %274 = arith.addf %272, %273 : vector<1x128xf32>
    %275 = arith.index_cast %c7_i32 : i32 to index
    %c0_67 = arith.constant 0 : index
    %276 = vector.load %arg13[%275, %c0_67] : memref<8x128xf32, #tpu.memory_space<vmem>>, vector<1x128xf32>
    tpu.vector_store %arg13[%275, %c0_67], %274 {strides = array<i32>} : memref<8x128xf32, #tpu.memory_space<vmem>>, vector<1x128xf32>,
    %c8_i32 = arith.constant 8 : i32
    %c0_68 = arith.constant 0 : index
    %c0_69 = arith.constant 0 : index
    %277 = vector.load %arg11[%c0_68, %c0_69] : memref<1x128xf32, #tpu.memory_space<vmem>>, vector<1x128xf32>
    tpu.vector_store %arg11[%c0_68, %c0_69], %274 {strides = array<i32>} : memref<1x128xf32, #tpu.memory_space<vmem>>, vector<1x128xf32>,
    %c0_70 = arith.constant 0 : index
    %c0_71 = arith.constant 0 : index
    %278 = vector.load %arg13[%c0_70, %c0_71] : memref<8x128xf32, #tpu.memory_space<vmem>>, vector<8x128xf32>
    %c0_72 = arith.constant 0 : index
    %c0_73 = arith.constant 0 : index
    %279 = vector.load %arg8[%c0_72, %c0_73] : memref<128x128xf32, #tpu.memory_space<vmem>>, vector<128x128xf32>
    %cst_74 = arith.constant dense<0.000000e+00> : vector<8x128xf32>
    %280 = tpu.matmul %278, %279, %cst_74 {dimension_numbers = #tpu.dot_dimension_numbers<[1], [0], [0], [1], [0, 0, 1, 1], [], []>} : vector<8x128xf32>, vector<128x128xf32>, vector<8x128xf32> -> vector<8x128xf32>
    %c0_75 = arith.constant 0 : index
    %c0_76 = arith.constant 0 : index
    %281 = vector.load %arg9[%c0_75, %c0_76] : memref<1x128xf32, #tpu.memory_space<vmem>>, vector<1x128xf32>
    %282 = vector.broadcast %281 : vector<1x128xf32> to vector<8x128xf32>
    %283 = arith.addf %280, %282 : vector<8x128xf32>
    %284 = tpu.iota {dimensions = array<i32: 1>} : vector<8x128xi32>
    %c64_i32 = arith.constant 64 : i32
    %285 = vector.broadcast %c64_i32 : i32 to vector<8x128xi32>
    %286 = arith.cmpi slt, %284, %285 : vector<8x128xi32>
    %cst_77 = arith.constant -1.000000e+30 : f32
    %287 = vector.broadcast %cst_77 : f32 to vector<8x128xf32>
    %288 = arith.select %286, %283, %287 : vector<8x128xi1>, vector<8x128xf32>
    %cst_78 = arith.constant dense<0xFF800000> : vector<8xf32>
    %289 = vector.multi_reduction <maximumf>, %288, %cst_78 [1] : vector<8x128xf32> to vector<8xf32>
    %290 = vector.shape_cast %289 : vector<8xf32> to vector<8x1xf32>
    %291 = vector.broadcast %290 : vector<8x1xf32> to vector<8x128xf32>
    %292 = arith.subf %288, %291 : vector<8x128xf32>
    %293 = math.exp %292 : vector<8x128xf32>
    %cst_79 = arith.constant dense<0.000000e+00> : vector<8xf32>
    %294 = vector.multi_reduction <add>, %293, %cst_79 [1] : vector<8x128xf32> to vector<8xf32>
    %295 = vector.shape_cast %294 : vector<8xf32> to vector<8x1xf32>
    %296 = math.log %295 : vector<8x1xf32>
    %297 = vector.broadcast %296 : vector<8x1xf32> to vector<8x128xf32>
    %298 = arith.subf %292, %297 : vector<8x128xf32>
    %c0_80 = arith.constant 0 : index
    %c0_81 = arith.constant 0 : index
    %299 = vector.load %arg10[%c0_80, %c0_81] : memref<8x128xf32, #tpu.memory_space<vmem>>, vector<8x128xf32>
    tpu.vector_store %arg10[%c0_80, %c0_81], %298 {strides = array<i32>} : memref<8x128xf32, #tpu.memory_space<vmem>>, vector<8x128xf32>,
    return
  }
  func.func @transform_0(%arg0: i32) -> (i32, i32) {
    %c0_i32 = arith.constant 0 : i32
    %c0_i32_0 = arith.constant 0 : i32
    %c0_i32_1 = arith.constant 0 : i32
    return %c0_i32, %c0_i32_0 : i32, i32
  }
  func.func @transform_1(%arg0: i32) -> (i32, i32) {
    %c0_i32 = arith.constant 0 : i32
    %c0_i32_0 = arith.constant 0 : i32
    %c0_i32_1 = arith.constant 0 : i32
    return %c0_i32, %c0_i32_0 : i32, i32
  }
  func.func @transform_2(%arg0: i32) -> (i32, i32) {
    %c0_i32 = arith.constant 0 : i32
    %c0_i32_0 = arith.constant 0 : i32
    %c0_i32_1 = arith.constant 0 : i32
    return %c0_i32, %c0_i32_0 : i32, i32
  }
  func.func @transform_3(%arg0: i32) -> (i32, i32) {
    %c0_i32 = arith.constant 0 : i32
    %c0_i32_0 = arith.constant 0 : i32
    %c0_i32_1 = arith.constant 0 : i32
    return %c0_i32, %c0_i32_0 : i32, i32
  }
  func.func @transform_4(%arg0: i32) -> (i32, i32) {
    %c0_i32 = arith.constant 0 : i32
    %c0_i32_0 = arith.constant 0 : i32
    %c0_i32_1 = arith.constant 0 : i32
    return %c0_i32, %c0_i32_0 : i32, i32
  }
  func.func @transform_5(%arg0: i32) -> (i32, i32) {
    %c0_i32 = arith.constant 0 : i32
    %c0_i32_0 = arith.constant 0 : i32
    %c0_i32_1 = arith.constant 0 : i32
    return %c0_i32, %c0_i32_0 : i32, i32
  }
  func.func @transform_6(%arg0: i32) -> (i32, i32) {
    %c0_i32 = arith.constant 0 : i32
    %c0_i32_0 = arith.constant 0 : i32
    %c0_i32_1 = arith.constant 0 : i32
    return %c0_i32, %c0_i32_0 : i32, i32
  }
  func.func @transform_7(%arg0: i32) -> (i32, i32) {
    %c0_i32 = arith.constant 0 : i32
    %c0_i32_0 = arith.constant 0 : i32
    %c0_i32_1 = arith.constant 0 : i32
    return %c0_i32, %c0_i32_0 : i32, i32
  }
  func.func @transform_8(%arg0: i32) -> (i32, i32) {
    %c0_i32 = arith.constant 0 : i32
    %c0_i32_0 = arith.constant 0 : i32
    %c0_i32_1 = arith.constant 0 : i32
    return %c0_i32, %c0_i32_0 : i32, i32
  }
  func.func @transform_9(%arg0: i32) -> (i32, i32) {
    %c0_i32 = arith.constant 0 : i32
    %c0_i32_0 = arith.constant 0 : i32
    %c0_i32_1 = arith.constant 0 : i32
    return %c0_i32, %c0_i32_0 : i32, i32
  }
  func.func @transform_10(%arg0: i32) -> (i32, i32) {
    %c0_i32 = arith.constant 0 : i32
    %c0_i32_0 = arith.constant 0 : i32
    %c0_i32_1 = arith.constant 0 : i32
    return %c0_i32, %c0_i32_0 : i32, i32
  }
}

</mosaic_0001>

<bundles_post_ra>
// kernel: tpu_custom_call.1
= control target key start
LH: loop header
LB: loop body
LE: loop exit
PB: predicated region body
PF: predicated region fallthrough
CT: control target
= control target key end

     0   :  { %16 = vsyncpa [#allocation5], 0  ;;  %s3804_s0 = inlined_call_operand.vmem [shape: s32[8,1], index: 0, kind: input, shape index: {}]   ;;  %s3805_s1 = inlined_call_operand.hbm [shape: f32[128,128], index: 1, kind: input, shape index: {}]   ;;  %s3806_s2 = inlined_call_operand.vmem [shape: f32[1,128], index: 2, kind: input, shape index: {}]   ;;  %s3807_s3 = inlined_call_operand.hbm [shape: f32[128,384], index: 3, kind: input, shape index: {}]   ;;  %s3808_s4 = inlined_call_operand.vmem [shape: f32[1,384], index: 4, kind: input, shape index: {}]   ;;  %s3809_s5 = inlined_call_operand.hbm [shape: f32[128,384], index: 5, kind: input, shape index: {}]   ;;  %s3810_s6 = inlined_call_operand.vmem [shape: f32[1,384], index: 6, kind: input, shape index: {}]   ;;  %s3811_s7 = inlined_call_operand.hbm [shape: f32[128,128], index: 7, kind: input, shape index: {}]   ;;  %s3812_s8 = inlined_call_operand.vmem [shape: f32[1,128], index: 8, kind: input, shape index: {}]   ;;  %s3813_s9 = inlined_call_operand.hbm [shape: f32[8,128], index: 9, kind: output, shape index: {0}]   ;;  %s3814_s10 = inlined_call_operand.hbm [shape: f32[1,128], index: 10, kind: output, shape index: {1}]  }
   0x1   :  { %17 = vsyncpa [#allocation8], 0 }
   0x2   :  { %18 = vsyncpa [#allocation11], 0 }
   0x3   :  { %19 = vsyncpa [#allocation6], 0 }
   0x4   :  { %20 = vsyncpa [#allocation14], 0  ;;  %s2829_s13 = smov [#allocation7]  }
   0x5   :  { %s42_s14 = sshll.u32 %s2829_s13, 4  ;;  %s43_s14 = int_to_ptr.vmem [resolvable:$true] %s42_s14 }
   0x6   :  { %s2707_s15 = scalar_lea.vmem %s43_s14, 6144  ;;  %p2712_p1 = scmp.lt.s32.totalorder %s43_s14, %s43_s14 }
   0x7   :  { %p2708_p0 = scmp.ne.s32.totalorder %s43_s14, %s2707_s15  ;;  %p2713_p2 = scmp.lt.s32.totalorder %s2707_s15, %s2707_s15 }
   0x9   :  { %p2714_p3 = por %p2713_p2, %p2712_p1 }
   0xb   :  { %p2715_p4 = pnand %p2714_p3, %p2708_p0 }
   0xd   :  { %2718 = shalt.err (!%p2715_p4)
}
   0xe   :  { %s2830_s16 = smov 384   ;;  %s2831_s17 = smov 24  }
   0xf   :  { %48 = dma.hbm_to_vmem [thread:$0]  %s3807_s3, 6144, %s43_s14, [#allocation8], %s2830_s16, %s2830_s16, %s2831_s17  }
  0x10   :  { %s2832_s20 = smov [#allocation4]  }
  0x11   :  { %s28_s21 = sshll.u32 %s2832_s20, 4  ;;  %s29_s21 = int_to_ptr.vmem [resolvable:$true] %s28_s21 }
  0x12   :  { %s2727_s22 = scalar_lea.vmem %s29_s21, 2048  ;;  %p2732_p6 = scmp.lt.s32.totalorder %s29_s21, %s29_s21 }
  0x13   :  { %p2728_p5 = scmp.ne.s32.totalorder %s29_s21, %s2727_s22  ;;  %p2733_p7 = scmp.lt.s32.totalorder %s2727_s22, %s2727_s22 }
  0x15   :  { %p2734_p8 = por %p2733_p7, %p2732_p6 }
  0x17   :  { %p2735_p9 = pnand %p2734_p8, %p2728_p5 }
  0x19   :  { %2738 = shalt.err (!%p2735_p9)
}
  0x1a   :  { %s2833_s23 = smov 128   ;;  %s2834_s24 = smov 8  }
  0x1b   :  { %34 = dma.hbm_to_vmem [thread:$0]  %s3805_s1, 2048, %s29_s21, [#allocation5], %s2833_s23, %s2833_s23, %s2834_s24  }
  0x1c   :  { %s2835_s27 = smov [#allocation9]   ;;  %s2836_s29 = smov [#allocation10]  }
  0x1d   :  { %s56_s28 = sshll.u32 %s2835_s27, 4  ;;  %s70_s3 = sshll.u32 %s2836_s29, 4  ;;  %s57_s28 = int_to_ptr.vmem [resolvable:$true] %s56_s28  ;;  %s71_s3 = int_to_ptr.vmem [resolvable:$true] %s70_s3 }
  0x1e   :  { %s2747_s30 = scalar_lea.vmem %s57_s28, 6144  ;;  %p2752_p11 = scmp.lt.s32.totalorder %s57_s28, %s57_s28 }
  0x1f   :  { %p2748_p10 = scmp.ne.s32.totalorder %s57_s28, %s2747_s30  ;;  %p2753_p12 = scmp.lt.s32.totalorder %s2747_s30, %s2747_s30 }
  0x21   :  { %p2754_p13 = por %p2753_p12, %p2752_p11 }
  0x23   :  { %p2755_p0 = pnand %p2754_p13, %p2748_p10 }
  0x25   :  { %2758 = shalt.err (!%p2755_p0)
}
  0x26   :  { %62 = dma.hbm_to_vmem [thread:$0]  %s3809_s5, 6144, %s57_s28, [#allocation8], %s2830_s16, %s2830_s16, %s2831_s17  }
  0x27   :  { %s2767_s1 = scalar_lea.vmem %s71_s3, 2048  ;;  %p2772_p2 = scmp.lt.s32.totalorder %s71_s3, %s71_s3 }
  0x28   :  { %p2768_p1 = scmp.ne.s32.totalorder %s71_s3, %s2767_s1  ;;  %p2773_p3 = scmp.lt.s32.totalorder %s2767_s1, %s2767_s1 }
  0x2a   :  { %p2774_p4 = por %p2773_p3, %p2772_p2 }
  0x2c   :  { %p2775_p5 = pnand %p2774_p4, %p2768_p1 }
  0x2e   :  { %2778 = shalt.err (!%p2775_p5)
}
  0x2f   :  { %76 = dma.hbm_to_vmem [thread:$0]  %s3811_s7, 2048, %s71_s3, [#allocation11], %s2833_s23, %s2833_s23, %s2834_s24  }
  0x30   :  { %2819 = dma.done.wait [#allocation5], 2048  }
  0x31   :  { %2820 = vsyncadd [#allocation5], 4294965248 }
  0x32   :  { %2821 = dma.done.wait [#allocation8], 12288  }
  0x33   :  { %2822 = vsyncadd [#allocation8], 4294955008 }
  0x34   :  { %2823 = dma.done.wait [#allocation11], 2048  }
  0x35   :  { %2824 = vsyncadd [#allocation11], 4294965248  ;;  %v2837_v0 = vmov 0   ;;  %v3818_v1 = vmov 0.0   ;;  %vm2839_vm0 = vmmov 0   ;;  %v93_v2 = vld [vmem:[%s3804_s0] sm:$0xff]  ;;  %v91_v49 = vlaneseq }
  0x36   :  { %2566 = vset.pattern.permute.xlu0 %v2837_v0  ;;  %2167 = vmatprep.subr.mxu0 %v3818_v1  ;;  %396 = vst [vmem:[#allocation3] sm:$0xff] %v3818_v1  ;;  %v115_v3 = vld [vmem:[#allocation4 + $0x78] sm:$0xff]  ;;  %v114_v4 = vld [vmem:[#allocation4 + $0x70] sm:$0xff]  ;;  %v113_v5 = vld [vmem:[#allocation4 + $0x68] sm:$0xff]  ;;  %v2840_v53 = vmov 1.0   ;;  %s2841_s19 = smov [#allocation13]  }
  0x37   :  { %316 = vmatprep.mubr.f32.mxu1 %v3818_v1  ;;  %2199 = vmatprep.mubr.msk.f32.mxu0 %vm2839_vm0, %v3818_v1  ;;  %v112_v6 = vld [vmem:[#allocation4 + $0x60] sm:$0xff]  ;;  %v233_v7 = vld [vmem:[#allocation7 + $0x170] sm:$0xff]  ;;  %v111_v8 = vld [vmem:[#allocation4 + $0x58] sm:$0xff]  ;;  %v2941_v50 = vand.u32 127, %v91_v49  ;;  %s1946_s20 = sshll.u32 %s2841_s19, 4  ;;  %s1947_s20 = int_to_ptr.vmem [resolvable:$true] %s1946_s20 }
  0x38   :  { %95 = vperm.xlu0 %2566, %v93_v2   ;;  %2168 = vmatpush3.msra.mxu0 %v115_v3  ;;  %v232_v9 = vld [vmem:[#allocation7 + $0x168] sm:$0xff]  ;;  %v230_v10 = vld [vmem:[#allocation7 + $0x158] sm:$0xff]  ;;  %v229_v11 = vld [vmem:[#allocation7 + $0x150] sm:$0xff]  ;;  %s2779_s21 = scalar_lea.vmem %s1947_s20, 16  ;;  %s2783_s22 = scalar_lea.vmem %s1947_s20, 32 }
  0x39   :  { %2169 = vmatprep.subr.mxu0 %v3818_v1  ;;  %252 = vmatprep.subr.mxu1 %v233_v7  ;;  %v227_v12 = vld [vmem:[#allocation7 + $0x140] sm:$0xff]  ;;  %v110_v13 = vld [vmem:[#allocation4 + $0x50] sm:$0xff]  ;;  %v226_v14 = vld [vmem:[#allocation7 + $0x138] sm:$0xff]  ;;  %3841 = vst [vmem:[#allocation20_spill] sm:$0xff] %v2941_v50  ;;  %p2780_p6 = scmp.ne.s32.totalorder %s1947_s20, %s2779_s21  ;;  %p2784_p7 = scmp.lt.s32.totalorder %s1947_s20, %s1947_s20 }
  0x3a   :  { %2170 = vmatpush3.msra.mxu0 %v114_v4  ;;  %253 = vmatpush1.msra.mxu1 %v232_v9  ;;  %v224_v15 = vld [vmem:[#allocation7 + $0x128] sm:$0xff]  ;;  %v223_v17 = vld [vmem:[#allocation7 + $0x120] sm:$0xff]  ;;  %v221_v18 = vld [vmem:[#allocation7 + $0x110] sm:$0xff]  ;;  %p2785_p8 = scmp.lt.s32.totalorder %s2783_s22, %s2779_s21 }
  0x3b   :  { %2171 = vmatprep.subr.mxu0 %v3818_v1  ;;  %254 = vmatprep.subr.mxu1 %v230_v10  ;;  %v109_v16 = vld [vmem:[#allocation4 + $0x48] sm:$0xff]  ;;  %v108_v19 = vld [vmem:[#allocation4 + $0x40] sm:$0xff]  ;;  %v218_v21 = vld [vmem:[#allocation7 + $0xf8] sm:$0xff] }
  0x3c   :  { %2172 = vmatpush3.msra.mxu0 %v113_v5  ;;  %255 = vmatpush1.msra.mxu1 %v229_v11  ;;  %v220_v20 = vld [vmem:[#allocation7 + $0x108] sm:$0xff]  ;;  %v107_v22 = vld [vmem:[#allocation4 + $0x38] sm:$0xff]  ;;  %v217_v23 = vld [vmem:[#allocation7 + $0xf0] sm:$0xff]  ;;  %p2786_p9 = por %p2785_p8, %p2784_p7 }
  0x3d   :  { %2173 = vmatprep.subr.mxu0 %v3818_v1  ;;  %256 = vmatprep.subr.mxu1 %v227_v12  ;;  %v215_v24 = vld [vmem:[#allocation7 + $0xe0] sm:$0xff]  ;;  %v106_v25 = vld [vmem:[#allocation4 + $0x30] sm:$0xff]  ;;  %v214_v26 = vld [vmem:[#allocation7 + $0xd8] sm:$0xff] }
  0x3e   :  { %2174 = vmatpush3.msra.mxu0 %v112_v6  ;;  %257 = vmatpush1.msra.mxu1 %v226_v14  ;;  %v212_v27 = vld [vmem:[#allocation7 + $0xc8] sm:$0xff]  ;;  %v211_v29 = vld [vmem:[#allocation7 + $0xc0] sm:$0xff]  ;;  %v209_v30 = vld [vmem:[#allocation7 + $0xb0] sm:$0xff]  ;;  %p2787_p10 = pnand %p2786_p9, %p2780_p6 }
  0x3f   :  { %2175 = vmatprep.subr.mxu0 %v3818_v1  ;;  %258 = vmatprep.subr.mxu1 %v224_v15  ;;  %v105_v28 = vld [vmem:[#allocation4 + $0x28] sm:$0xff]  ;;  %v104_v31 = vld [vmem:[#allocation4 + $0x20] sm:$0xff]  ;;  %v206_v33 = vld [vmem:[#allocation7 + $0x98] sm:$0xff] }
  0x40   :  { %2176 = vmatpush3.msra.mxu0 %v111_v8  ;;  %259 = vmatpush1.msra.mxu1 %v223_v17  ;;  %v208_v32 = vld [vmem:[#allocation7 + $0xa8] sm:$0xff]  ;;  %v103_v34 = vld [vmem:[#allocation4 + $0x18] sm:$0xff]  ;;  %v205_v35 = vld [vmem:[#allocation7 + $0x90] sm:$0xff] }
  0x41   :  { %2177 = vmatprep.subr.mxu0 %v3818_v1  ;;  %260 = vmatprep.subr.mxu1 %v221_v18  ;;  %v203_v36 = vld [vmem:[#allocation7 + $0x80] sm:$0xff]  ;;  %v102_v37 = vld [vmem:[#allocation4 + $0x10] sm:$0xff]  ;;  %v202_v38 = vld [vmem:[#allocation7 + $0x78] sm:$0xff] }
  0x42   :  { %2178 = vmatpush3.msra.mxu0 %v110_v13  ;;  %261 = vmatpush1.msra.mxu1 %v220_v20  ;;  %v200_v39 = vld [vmem:[#allocation7 + $0x68] sm:$0xff]  ;;  %v199_v41 = vld [vmem:[#allocation7 + $0x60] sm:$0xff]  ;;  %v197_v42 = vld [vmem:[#allocation7 + $0x50] sm:$0xff] }
  0x43   :  { %2179 = vmatprep.subr.mxu0 %v3818_v1  ;;  %262 = vmatprep.subr.mxu1 %v218_v21  ;;  %v101_v40 = vld [vmem:[#allocation4 + $0x8] sm:$0xff]  ;;  %v100_v43 = vld [vmem:[#allocation4] sm:$0xff]  ;;  %v194_v45 = vld [vmem:[#allocation7 + $0x38] sm:$0xff] }
  0x44   :  { %2180 = vmatpush3.msra.mxu0 %v109_v16  ;;  %263 = vmatpush1.msra.mxu1 %v217_v23  ;;  %v196_v44 = vld [vmem:[#allocation7 + $0x48] sm:$0xff]  ;;  %v193_v46 = vld [vmem:[#allocation7 + $0x30] sm:$0xff]  ;;  %v191_v47 = vld [vmem:[#allocation7 + $0x20] sm:$0xff] }
  0x45   :  { %2181 = vmatprep.subr.mxu0 %v3818_v1  ;;  %264 = vmatprep.subr.mxu1 %v215_v24  ;;  %v190_v48 = vld [vmem:[#allocation7 + $0x18] sm:$0xff]  ;;  %v231_v54 = vld [vmem:[#allocation7 + $0x160] sm:$0xff]  ;;  %v228_v55 = vld [vmem:[#allocation7 + $0x148] sm:$0xff] }
  0x46   :  { %2182 = vmatpush3.msra.mxu0 %v108_v19  ;;  %265 = vmatpush1.msra.mxu1 %v214_v26  ;;  %v234_v52 = vld [vmem:[#allocation7 + $0x178] sm:$0xff]  ;;  %v225_v56 = vld [vmem:[#allocation7 + $0x130] sm:$0xff]  ;;  %v219_v58 = vld [vmem:[#allocation7 + $0x100] sm:$0xff] }
  0x47   :  { %2183 = vmatprep.subr.mxu0 %v3818_v1  ;;  %266 = vmatprep.subr.mxu1 %v212_v27  ;;  %v222_v57 = vld [vmem:[#allocation7 + $0x118] sm:$0xff]  ;;  %v216_v59 = vld [vmem:[#allocation7 + $0xe8] sm:$0xff]  ;;  %v213_v60 = vld [vmem:[#allocation7 + $0xd0] sm:$0xff] }
  0x48   :  { %2184 = vmatpush3.msra.mxu0 %v107_v22  ;;  %267 = vmatpush1.msra.mxu1 %v211_v29  ;;  %v210_v61 = vld [vmem:[#allocation7 + $0xb8] sm:$0xff]  ;;  %v207_v62 = vld [vmem:[#allocation7 + $0xa0] sm:$0xff]  ;;  %v204_v63 = vld [vmem:[#allocation7 + $0x88] sm:$0xff] }
  0x49   :  { %2185 = vmatprep.subr.mxu0 %v3818_v1  ;;  %268 = vmatprep.subr.mxu1 %v209_v30  ;;  %v201_v0 = vld [vmem:[#allocation7 + $0x70] sm:$0xff]  ;;  %v198_v2 = vld [vmem:[#allocation7 + $0x58] sm:$0xff]  ;;  %v195_v3 = vld [vmem:[#allocation7 + $0x40] sm:$0xff] }
  0x4a   :  { %2186 = vmatpush3.msra.mxu0 %v106_v25  ;;  %269 = vmatpush1.msra.mxu1 %v208_v32  ;;  %v188_v4 = vld [vmem:[#allocation7 + $0x8] sm:$0xff]  ;;  %v187_v6 = vld [vmem:[#allocation7] sm:$0xff]  ;;  %v189_v7 = vld [vmem:[#allocation7 + $0x10] sm:$0xff] }
  0x4b   :  { %2187 = vmatprep.subr.mxu0 %v3818_v1  ;;  %270 = vmatprep.subr.mxu1 %v206_v33  ;;  %v192_v5 = vld [vmem:[#allocation7 + $0x28] sm:$0xff]  ;;  %v2961_v8 = vld [vmem:[#allocation9 + $0x170] sm:$0xff]  ;;  %v2967_v13 = vld [vmem:[#allocation9 + $0x158] sm:$0xff] }
  0x4c   :  { %2188 = vmatpush3.msra.mxu0 %v105_v28  ;;  %271 = vmatpush1.msra.mxu1 %v205_v35  ;;  %3842 = vst [vmem:[#allocation21_spill] sm:$0xff] %v2961_v8  ;;  %v2965_v11 = vld [vmem:[#allocation9 + $0x168] sm:$0xff]  ;;  %v2969_v14 = vld [vmem:[#allocation9 + $0x178] sm:$0xff]  ;;  %v2971_v15 = vld [vmem:[#allocation9 + $0x150] sm:$0xff] }
  0x4d   :  { %2189 = vmatprep.subr.mxu0 %v3818_v1  ;;  %272 = vmatprep.subr.mxu1 %v203_v36  ;;  %v2974_v16 = vld [vmem:[#allocation9 + $0x140] sm:$0xff]  ;;  %v2980_v18 = vld [vmem:[#allocation9 + $0x138] sm:$0xff]  ;;  %v2984_v19 = vld [vmem:[#allocation9 + $0x128] sm:$0xff] }
  0x4e   :  { %2190 = vmatpush3.msra.mxu0 %v104_v31  ;;  %273 = vmatpush1.msra.mxu1 %v202_v38  ;;  %v2977_v17 = vld [vmem:[#allocation9 + $0x160] sm:$0xff]  ;;  %v2987_v20 = vld [vmem:[#allocation9 + $0x148] sm:$0xff]  ;;  %v2994_v22 = vld [vmem:[#allocation9 + $0x110] sm:$0xff] }
  0x4f   :  { %2191 = vmatprep.subr.mxu0 %v3818_v1  ;;  %274 = vmatprep.subr.mxu1 %v200_v39  ;;  %v2990_v21 = vld [vmem:[#allocation9 + $0x120] sm:$0xff]  ;;  %v2997_v23 = vld [vmem:[#allocation9 + $0x130] sm:$0xff]  ;;  %v3000_v24 = vld [vmem:[#allocation9 + $0x108] sm:$0xff] }
  0x50   :  { %2192 = vmatpush3.msra.mxu0 %v103_v34  ;;  %275 = vmatpush1.msra.mxu1 %v199_v41  ;;  %v3004_v25 = vld [vmem:[#allocation9 + $0xf8] sm:$0xff]  ;;  %v3010_v27 = vld [vmem:[#allocation9 + $0xf0] sm:$0xff]  ;;  %v3014_v28 = vld [vmem:[#allocation9 + $0xe0] sm:$0xff] }
  0x51   :  { %2193 = vmatprep.subr.mxu0 %v3818_v1  ;;  %276 = vmatprep.subr.mxu1 %v197_v42  ;;  %v3007_v26 = vld [vmem:[#allocation9 + $0x118] sm:$0xff]  ;;  %v3017_v29 = vld [vmem:[#allocation9 + $0x100] sm:$0xff]  ;;  %v3024_v31 = vld [vmem:[#allocation9 + $0xc8] sm:$0xff] }
  0x52   :  { %2194 = vmatpush3.msra.mxu0 %v102_v37  ;;  %277 = vmatpush1.msra.mxu1 %v196_v44  ;;  %v3020_v30 = vld [vmem:[#allocation9 + $0xd8] sm:$0xff]  ;;  %v3027_v32 = vld [vmem:[#allocation9 + $0xe8] sm:$0xff]  ;;  %v3030_v33 = vld [vmem:[#allocation9 + $0xc0] sm:$0xff] }
  0x53   :  { %2195 = vmatprep.subr.mxu0 %v3818_v1  ;;  %278 = vmatprep.subr.mxu1 %v194_v45  ;;  %v3034_v34 = vld [vmem:[#allocation9 + $0xb0] sm:$0xff]  ;;  %v3040_v36 = vld [vmem:[#allocation9 + $0xa8] sm:$0xff]  ;;  %v3044_v37 = vld [vmem:[#allocation9 + $0x98] sm:$0xff] }
  0x54   :  { %2196 = vmatpush3.msra.mxu0 %v101_v40  ;;  %279 = vmatpush1.msra.mxu1 %v193_v46  ;;  %v3037_v35 = vld [vmem:[#allocation9 + $0xd0] sm:$0xff]  ;;  %v3047_v38 = vld [vmem:[#allocation9 + $0xb8] sm:$0xff]  ;;  %v3054_v40 = vld [vmem:[#allocation9 + $0x80] sm:$0xff] }
  0x55   :  { %2197 = vmatprep.subr.mxu0 %v3818_v1  ;;  %280 = vmatprep.subr.mxu1 %v191_v47  ;;  %v3050_v39 = vld [vmem:[#allocation9 + $0x90] sm:$0xff]  ;;  %v3057_v41 = vld [vmem:[#allocation9 + $0xa0] sm:$0xff]  ;;  %v3060_v42 = vld [vmem:[#allocation9 + $0x78] sm:$0xff] }
  0x56   :  { %2198 = vmatpush3.msra.mxu0 %v100_v43  ;;  %281 = vmatpush1.msra.mxu1 %v190_v48  ;;  %v3064_v43 = vld [vmem:[#allocation9 + $0x68] sm:$0xff]  ;;  %v3070_v45 = vld [vmem:[#allocation9 + $0x60] sm:$0xff]  ;;  %v3074_v46 = vld [vmem:[#allocation9 + $0x50] sm:$0xff] }
  0x57   :  { %2202 = vmatprep.subr.mxu0 %v3818_v1  ;;  %282 = vmatprep.subr.mxu1 %v188_v4  ;;  %v3067_v44 = vld [vmem:[#allocation9 + $0x88] sm:$0xff]  ;;  %v3077_v47 = vld [vmem:[#allocation9 + $0x70] sm:$0xff] }
  0x58   :  { %283 = vmatpush1.msra.mxu1 %v187_v6  ;;  %v3080_v48 = vld [vmem:[#allocation9 + $0x48] sm:$0xff] }
  0x59   :  { %464 = vmatprep.subr.mxu1 %v2961_v8 }
  0xb3   :  { %v96_v51 = vpop.permute.xlu0 %95 }
  0xb4   :  { %vm97_vm1 = vcmp.eq.s32.totalorder %v2941_v50, %v96_v51  ;;  %v3084_v51 = vld [vmem:[#allocation9 + $0x38] sm:$0xff] }
  0xb5   :  { %2200 = vmatmul.mubr.msk.f32.vlgmr.msra.gmra.mxu0 %vm97_vm1, %v2840_v53  ;;  %v3090_v53 = vld [vmem:[#allocation9 + $0x30] sm:$0xff] }
  0xb6   :  { %2203 = vmatpush3.msra.mxu0 %v234_v52  ;;  %2234 = vmatprep.mubr.msk.f32.mxu0 %vm2839_vm0, %v3818_v1  ;;  %v3087_v52 = vld [vmem:[#allocation9 + $0x58] sm:$0xff] }
  0xb7   :  { %2204 = vmatprep.subr.mxu0 %v3818_v1 }
  0xb8   :  { %2205 = vmatpush3.msra.mxu0 %v231_v54  ;;  %v3094_v54 = vld [vmem:[#allocation9 + $0x20] sm:$0xff] }
  0xb9   :  { %2206 = vmatprep.subr.mxu0 %v3818_v1  ;;  %3843 = vst [vmem:[#allocation22_spill] sm:$0xff] %v3094_v54 }
  0xba   :  { %2207 = vmatpush3.msra.mxu0 %v228_v55  ;;  %v3097_v55 = vld [vmem:[#allocation9 + $0x40] sm:$0xff] }
  0xbb   :  { %2208 = vmatprep.subr.mxu0 %v3818_v1 }
  0xbc   :  { %2209 = vmatpush3.msra.mxu0 %v225_v56  ;;  %v3100_v56 = vld [vmem:[#allocation9 + $0x18] sm:$0xff] }
  0xbd   :  { %2210 = vmatprep.subr.mxu0 %v3818_v1  ;;  %3844 = vst [vmem:[#allocation23_spill] sm:$0xff] %v3100_v56 }
  0xbe   :  { %2211 = vmatpush3.msra.mxu0 %v222_v57  ;;  %v3104_v57 = vld [vmem:[#allocation9 + $0x8] sm:$0xff] }
  0xbf   :  { %2212 = vmatprep.subr.mxu0 %v3818_v1  ;;  %3845 = vst [vmem:[#allocation24_spill] sm:$0xff] %v3104_v57 }
  0xc0   :  { %2213 = vmatpush3.msra.mxu0 %v219_v58  ;;  %v3107_v58 = vld [vmem:[#allocation9 + $0x28] sm:$0xff] }
  0xc1   :  { %2214 = vmatprep.subr.mxu0 %v3818_v1  ;;  %3846 = vst [vmem:[#allocation25_spill] sm:$0xff] %v3107_v58 }
  0xc2   :  { %2215 = vmatpush3.msra.mxu0 %v216_v59  ;;  %v3110_v59 = vld [vmem:[#allocation9] sm:$0xff] }
  0xc3   :  { %2216 = vmatprep.subr.mxu0 %v3818_v1  ;;  %3847 = vst [vmem:[#allocation26_spill] sm:$0xff] %v3110_v59 }
  0xc4   :  { %2217 = vmatpush3.msra.mxu0 %v213_v60  ;;  %v3117_v60 = vld [vmem:[%s3806_s2] sm:$0x1] }
  0xc5   :  { %2218 = vmatprep.subr.mxu0 %v3818_v1 }
  0xc6   :  { %2219 = vmatpush3.msra.mxu0 %v210_v61  ;;  %v3120_v61 = vld [vmem:[#allocation9 + $0x10] sm:$0xff] }
  0xc7   :  { %2220 = vmatprep.subr.mxu0 %v3818_v1  ;;  %3848 = vst [vmem:[#allocation27_spill] sm:$0xff] %v3120_v61 }
  0xc8   :  { %2221 = vmatpush3.msra.mxu0 %v207_v62  ;;  %v238_v62 = vshrl.u32 %v91_v49, 7  ;;  %v445_v49 = vld [vmem:[%s3810_s6] sm:$0x7] }
  0xc9   :  { %2222 = vmatprep.subr.mxu0 %v3818_v1 }
  0xca   :  { %2223 = vmatpush3.msra.mxu0 %v204_v63  ;;  %v239_v63 = vsub.s32 0, %v238_v62 }
  0xcb   :  { %2224 = vmatprep.subr.mxu0 %v3818_v1 }
  0xcc   :  { %2225 = vmatpush3.msra.mxu0 %v201_v0  ;;  %v247_v0 = vsub.s32 2, %v238_v62 }
  0xcd   :  { %2226 = vmatprep.subr.mxu0 %v3818_v1 }
  0xce   :  { %2227 = vmatpush3.msra.mxu0 %v198_v2  ;;  %v235_v2 = vld [vmem:[%s3808_s4] sm:$0x7] }
  0xcf   :  { %2228 = vmatprep.subr.mxu0 %v3818_v1  ;;  %v240_v4 = vrot.slane %v235_v2, %v239_v63 }
  0xd0   :  { %2229 = vmatpush3.msra.mxu0 %v195_v3  ;;  %v243_v3 = vsub.s32 1, %v238_v62 }
  0xd1   :  { %2230 = vmatprep.subr.mxu0 %v3818_v1 }
  0xd2   :  { %2231 = vmatpush3.msra.mxu0 %v192_v5  ;;  %v248_v5 = vrot.slane %v235_v2, %v247_v0  ;;  %v244_v6 = vrot.slane %v235_v2, %v243_v3 }
  0xd3   :  { %2232 = vmatprep.subr.mxu0 %v3818_v1 }
  0xd4   :  { %2233 = vmatpush3.msra.mxu0 %v189_v7 }
  0xd5   :  { %2237 = vmatprep.subr.mxu0 %v3818_v1 }
 0x175   :  { %v182_v9 = vpop.f32.mrf.mxu0 }
 0x176   :  { %v186_v10 = vmax.f32 %v182_v9, 0.0 }
 0x177   :  { %v2201_v12 = vpop.f32.mrf.mxu0 }
 0x178   :  { %317 = vmatmul.mubr.f32.vlgmr.msra.gmra.mxu1 %v186_v10  ;;  %2235 = vmatmul.mubr.f32.vlgmr.msra.gmra.mxu0 %v186_v10 }
 0x179   :  { %465 = vmatpush1.msra.mxu1 %v2965_v11  ;;  %528 = vmatprep.mubr.f32.mxu1 %v3818_v1 }
 0x17a   :  { %466 = vmatprep.subr.mxu1 %v2967_v13  ;;  %2238 = vmatpush3.msra.mxu0 %v2969_v14 }
 0x17b   :  { %467 = vmatpush1.msra.mxu1 %v2971_v15  ;;  %2239 = vmatprep.subr.mxu0 %v3818_v1 }
 0x17c   :  { %468 = vmatprep.subr.mxu1 %v2974_v16  ;;  %2240 = vmatpush3.msra.mxu0 %v2977_v17 }
 0x17d   :  { %469 = vmatpush1.msra.mxu1 %v2980_v18  ;;  %2241 = vmatprep.subr.mxu0 %v3818_v1 }
 0x17e   :  { %470 = vmatprep.subr.mxu1 %v2984_v19  ;;  %2242 = vmatpush3.msra.mxu0 %v2987_v20 }
 0x17f   :  { %471 = vmatpush1.msra.mxu1 %v2990_v21  ;;  %2243 = vmatprep.subr.mxu0 %v3818_v1 }
 0x180   :  { %472 = vmatprep.subr.mxu1 %v2994_v22  ;;  %2244 = vmatpush3.msra.mxu0 %v2997_v23 }
 0x181   :  { %473 = vmatpush1.msra.mxu1 %v3000_v24  ;;  %2245 = vmatprep.subr.mxu0 %v3818_v1 }
 0x182   :  { %474 = vmatprep.subr.mxu1 %v3004_v25  ;;  %2246 = vmatpush3.msra.mxu0 %v3007_v26 }
 0x183   :  { %475 = vmatpush1.msra.mxu1 %v3010_v27  ;;  %2247 = vmatprep.subr.mxu0 %v3818_v1 }
 0x184   :  { %476 = vmatprep.subr.mxu1 %v3014_v28  ;;  %2248 = vmatpush3.msra.mxu0 %v3017_v29 }
 0x185   :  { %477 = vmatpush1.msra.mxu1 %v3020_v30  ;;  %2249 = vmatprep.subr.mxu0 %v3818_v1 }
 0x186   :  { %478 = vmatprep.subr.mxu1 %v3024_v31  ;;  %2250 = vmatpush3.msra.mxu0 %v3027_v32 }
 0x187   :  { %479 = vmatpush1.msra.mxu1 %v3030_v33  ;;  %2251 = vmatprep.subr.mxu0 %v3818_v1 }
 0x188   :  { %480 = vmatprep.subr.mxu1 %v3034_v34  ;;  %2252 = vmatpush3.msra.mxu0 %v3037_v35 }
 0x189   :  { %481 = vmatpush1.msra.mxu1 %v3040_v36  ;;  %2253 = vmatprep.subr.mxu0 %v3818_v1 }
 0x18a   :  { %482 = vmatprep.subr.mxu1 %v3044_v37  ;;  %2254 = vmatpush3.msra.mxu0 %v3047_v38 }
 0x18b   :  { %483 = vmatpush1.msra.mxu1 %v3050_v39  ;;  %2255 = vmatprep.subr.mxu0 %v3818_v1 }
 0x18c   :  { %484 = vmatprep.subr.mxu1 %v3054_v40  ;;  %2256 = vmatpush3.msra.mxu0 %v3057_v41 }
 0x18d   :  { %485 = vmatpush1.msra.mxu1 %v3060_v42  ;;  %2257 = vmatprep.subr.mxu0 %v3818_v1 }
 0x18e   :  { %486 = vmatprep.subr.mxu1 %v3064_v43  ;;  %2258 = vmatpush3.msra.mxu0 %v3067_v44 }
 0x18f   :  { %487 = vmatpush1.msra.mxu1 %v3070_v45  ;;  %2259 = vmatprep.subr.mxu0 %v3818_v1 }
 0x190   :  { %488 = vmatprep.subr.mxu1 %v3074_v46  ;;  %2260 = vmatpush3.msra.mxu0 %v3077_v47 }
 0x191   :  { %489 = vmatpush1.msra.mxu1 %v3080_v48  ;;  %2261 = vmatprep.subr.mxu0 %v3818_v1 }
 0x192   :  { %490 = vmatprep.subr.mxu1 %v3084_v51  ;;  %2262 = vmatpush3.msra.mxu0 %v3087_v52 }
 0x193   :  { %491 = vmatpush1.msra.mxu1 %v3090_v53  ;;  %2263 = vmatprep.subr.mxu0 %v3818_v1 }
 0x194   :  { %492 = vmatprep.subr.mxu1 %v3094_v54  ;;  %2264 = vmatpush3.msra.mxu0 %v3097_v55 }
 0x195   :  { %493 = vmatpush1.msra.mxu1 %v3100_v56  ;;  %2265 = vmatprep.subr.mxu0 %v3818_v1 }
 0x196   :  { %494 = vmatprep.subr.mxu1 %v3104_v57  ;;  %2266 = vmatpush3.msra.mxu0 %v3107_v58 }
 0x197   :  { %495 = vmatpush1.msra.mxu1 %v3110_v59  ;;  %2267 = vmatprep.subr.mxu0 %v3818_v1 }
 0x198   :  { %529 = vmatmul.mubr.f32.vlgmr.msra.gmra.mxu1 %v3117_v60  ;;  %2268 = vmatpush3.msra.mxu0 %v3120_v61 }
 0x199   :  { %2269 = vmatprep.mubr.msk.f32.mxu0 %vm2839_vm0, %v3818_v1  ;;  %634 = vmatprep.subr.mxu1 %v2961_v8 }
 0x19a   :  { %2270 = vmatmul.mubr.f32.vlgmr.msra.gmra.mxu0 %v3117_v60  ;;  %2272 = vmatprep.subr.mxu0 %v3818_v1 }
 0x19b   :  { %635 = vmatpush1.msra.mxu1 %v2965_v11  ;;  %2273 = vmatpush3.msra.mxu0 %v2969_v14 }
 0x19c   :  { %636 = vmatprep.subr.mxu1 %v2967_v13  ;;  %2274 = vmatprep.subr.mxu0 %v3818_v1 }
 0x19d   :  { %637 = vmatpush1.msra.mxu1 %v2971_v15  ;;  %2275 = vmatpush3.msra.mxu0 %v2977_v17 }
 0x19e   :  { %638 = vmatprep.subr.mxu1 %v2974_v16  ;;  %2276 = vmatprep.subr.mxu0 %v3818_v1 }
 0x19f   :  { %639 = vmatpush1.msra.mxu1 %v2980_v18  ;;  %2277 = vmatpush3.msra.mxu0 %v2987_v20 }
 0x1a0   :  { %640 = vmatprep.subr.mxu1 %v2984_v19  ;;  %2278 = vmatprep.subr.mxu0 %v3818_v1 }
 0x1a1   :  { %641 = vmatpush1.msra.mxu1 %v2990_v21  ;;  %2279 = vmatpush3.msra.mxu0 %v2997_v23 }
 0x1a2   :  { %642 = vmatprep.subr.mxu1 %v2994_v22  ;;  %2280 = vmatprep.subr.mxu0 %v3818_v1 }
 0x1a3   :  { %643 = vmatpush1.msra.mxu1 %v3000_v24  ;;  %2281 = vmatpush3.msra.mxu0 %v3007_v26 }
 0x1a4   :  { %644 = vmatprep.subr.mxu1 %v3004_v25  ;;  %2282 = vmatprep.subr.mxu0 %v3818_v1 }
 0x1a5   :  { %645 = vmatpush1.msra.mxu1 %v3010_v27  ;;  %2283 = vmatpush3.msra.mxu0 %v3017_v29 }
 0x1a6   :  { %646 = vmatprep.subr.mxu1 %v3014_v28  ;;  %2284 = vmatprep.subr.mxu0 %v3818_v1 }
 0x1a7   :  { %647 = vmatpush1.msra.mxu1 %v3020_v30  ;;  %2285 = vmatpush3.msra.mxu0 %v3027_v32 }
 0x1a8   :  { %648 = vmatprep.subr.mxu1 %v3024_v31  ;;  %2286 = vmatprep.subr.mxu0 %v3818_v1 }
 0x1a9   :  { %649 = vmatpush1.msra.mxu1 %v3030_v33  ;;  %2287 = vmatpush3.msra.mxu0 %v3037_v35 }
 0x1aa   :  { %650 = vmatprep.subr.mxu1 %v3034_v34  ;;  %2288 = vmatprep.subr.mxu0 %v3818_v1 }
 0x1ab   :  { %651 = vmatpush1.msra.mxu1 %v3040_v36  ;;  %2289 = vmatpush3.msra.mxu0 %v3047_v38 }
 0x1ac   :  { %652 = vmatprep.subr.mxu1 %v3044_v37  ;;  %2290 = vmatprep.subr.mxu0 %v3818_v1 }
 0x1ad   :  { %653 = vmatpush1.msra.mxu1 %v3050_v39  ;;  %2291 = vmatpush3.msra.mxu0 %v3057_v41 }
 0x1ae   :  { %654 = vmatprep.subr.mxu1 %v3054_v40  ;;  %2292 = vmatprep.subr.mxu0 %v3818_v1 }
 0x1af   :  { %655 = vmatpush1.msra.mxu1 %v3060_v42  ;;  %2293 = vmatpush3.msra.mxu0 %v3067_v44 }
 0x1b0   :  { %656 = vmatprep.subr.mxu1 %v3064_v43  ;;  %2294 = vmatprep.subr.mxu0 %v3818_v1 }
 0x1b1   :  { %657 = vmatpush1.msra.mxu1 %v3070_v45  ;;  %2295 = vmatpush3.msra.mxu0 %v3077_v47 }
 0x1b2   :  { %658 = vmatprep.subr.mxu1 %v3074_v46  ;;  %2296 = vmatprep.subr.mxu0 %v3818_v1 }
 0x1b3   :  { %659 = vmatpush1.msra.mxu1 %v3080_v48  ;;  %2297 = vmatpush3.msra.mxu0 %v3087_v52 }
 0x1b4   :  { %660 = vmatprep.subr.mxu1 %v3084_v51  ;;  %2298 = vmatprep.subr.mxu0 %v3818_v1 }
 0x1b5   :  { %661 = vmatpush1.msra.mxu1 %v3090_v53  ;;  %2299 = vmatpush3.msra.mxu0 %v3097_v55 }
 0x1b6   :  { %662 = vmatprep.subr.mxu1 %v3094_v54  ;;  %2300 = vmatprep.subr.mxu0 %v3818_v1 }
 0x1b7   :  { %663 = vmatpush1.msra.mxu1 %v3100_v56  ;;  %2301 = vmatpush3.msra.mxu0 %v3107_v58 }
 0x1b8   :  { %664 = vmatprep.subr.mxu1 %v3104_v57  ;;  %2302 = vmatprep.subr.mxu0 %v3818_v1 }
 0x1b9   :  { %665 = vmatpush1.msra.mxu1 %v3110_v59  ;;  %698 = vmatprep.mubr.f32.mxu1 %v3818_v1  ;;  %v3209_v59 = vrot.slane %v445_v49, %v243_v3  ;;  %v3213_v3 = vrot.slane %v445_v49, %v247_v0  ;;  %v3855_v0 = vld [vmem:[#allocation27_spill] sm:$0xff] }
 0x1ba   :  { %2303 = vmatpush3.msra.mxu0 %v3120_v61  ;;  %2304 = vmatprep.mubr.msk.f32.mxu0 %vm2839_vm0, %v3818_v1  ;;  %v3207_v61 = vrot.slane %v445_v49, %v239_v63  ;;  %v3856_v49 = vld [vmem:[#allocation21_spill] sm:$0xff] }
 0x1bb   :  { %804 = vmatprep.subr.mxu1 %v2961_v8  ;;  %2307 = vmatprep.subr.mxu0 %v3818_v1 }
 0x1bc   :  { %3849 = vst [vmem:[#allocation28_spill] sm:$0xff] %v3207_v61 }
 0x238   :  { %v318_v7 = vpop.f32.mrf.mxu1  ;;  %v389_v9 = vpop.f32.mrf.mxu0 }
 0x239   :  { %v319_v10 = vadd.f32 %v318_v7, %v240_v4  ;;  %v390_v12 = vadd.f32 %v389_v9, %v248_v5 }
 0x23a   :  { %v320_v50 = vpop.f32.mrf.mxu1  ;;  %v2236_v8 = vpop.f32.mrf.mxu0 }
 0x23b   :  { %393 = vst [vmem:[#allocation2] sm:$0xff] %v319_v10  ;;  %395 = vst [vmem:[#allocation2 + $0x10] sm:$0xff] %v390_v12  ;;  %v321_v1 = vadd.f32 %v320_v50, %v244_v6 }
 0x23d   :  { %394 = vst [vmem:[#allocation2 + $0x8] sm:$0xff] %v321_v1 }
 0x244   :  { %v447_v57 = vld [vmem:[#allocation2] ss:$8 sm:$0x7] }
 0x245   :  { %v613_v1 = vrot.slane %v447_v57, 1 }
 0x258   :  { %v530_v62 = vpop.f32.mrf.mxu1 }
 0x259   :  { %v531_v2 = vadd.f32 %v530_v62, %v3207_v61 }
 0x25a   :  { %v532_v4 = vpop.f32.mrf.mxu1  ;;  %v601_v5 = vpop.f32.mrf.mxu0 }
 0x25b   :  { %v605_v7 = vadd.f32 %v531_v2, %v447_v57  ;;  %v533_v50 = vadd.f32 %v532_v4, %v3209_v59  ;;  %v602_v61 = vadd.f32 %v601_v5, %v3213_v3 }
 0x25c   :  { %v2271_v8 = vpop.f32.mrf.mxu0 }
 0x25d   :  { %v1963_v9 = vmul.f32 -1.442695, %v605_v7  ;;  %v615_v6 = vadd.f32 %v613_v1, %v533_v50  ;;  %v623_v7 = vrot.slane %v447_v57, 2  ;;  %v3851_v57 = vld [vmem:[#allocation23_spill] sm:$0xff] }
 0x25f   :  { %2567 = vpow2.f32 %v1963_v9  ;;  %v1964_v10 = vmul.f32 -1.442695, %v615_v6 }
 0x261   :  { %2569 = vpow2.f32 %v1964_v10 }
 0x26c   :  { %v2568_v63 = vpop.eup %2567 }
 0x26d   :  { %v609_v12 = vadd.f32 1.0, %v2568_v63 }
 0x26e   :  { %v2570_v58 = vpop.eup %2569 }
 0x26f   :  { %2571 = vrcp.f32 %v609_v12  ;;  %v619_v62 = vadd.f32 1.0, %v2570_v58  ;;  %v3852_v58 = vld [vmem:[#allocation25_spill] sm:$0xff]  ;;  %v3857_v12 = vld [vmem:[#allocation28_spill] sm:$0xff] }
 0x271   :  { %2573 = vrcp.f32 %v619_v62 }
 0x27c   :  { %v2572_v56 = vpop.eup %2571 }
 0x27d   :  { %v622_v2 = vmul.f32 %v2572_v56, %v602_v61  ;;  %v3850_v56 = vmov 0.0   ;;  %v3854_v61 = vld [vmem:[#allocation26_spill] sm:$0xff] }
 0x27e   :  { %v2574_v4 = vpop.eup %2573 }
 0x27f   :  { %v625_v8 = vadd.f32 %v623_v7, %v622_v2  ;;  %v627_v9 = vsub.f32 1.0, %v2574_v4  ;;  %v629_v6 = vmul.f32 %v2574_v4, %v3117_v60  ;;  %v3853_v60 = vld [vmem:[#allocation24_spill] sm:$0xff] }
 0x280   :  { %v633_v2 = vld [vmem:[#allocation2 + $0x1] ss:$8 sm:$0x7] }
 0x281   :  { %2575 = vtanh.f32 %v625_v8 }
 0x28e   :  { %v2576_v50 = vpop.eup %2575 }
 0x28f   :  { %v628_v1 = vmul.f32 %v2576_v50, %v627_v9 }
 0x291   :  { %v3217_v10 = vadd.f32 %v629_v6, %v628_v1  ;;  %v783_v1 = vrot.slane %v633_v2, 1 }
 0x293   :  { %631 = vst [vmem:[#allocation3] sm:$0x1] %v3217_v10  ;;  %699 = vmatmul.mubr.f32.vlgmr.msra.gmra.mxu1 %v3217_v10  ;;  %2305 = vmatmul.mubr.f32.vlgmr.msra.gmra.mxu0 %v3217_v10 }
 0x294   :  { %805 = vmatpush1.msra.mxu1 %v2965_v11  ;;  %2308 = vmatpush3.msra.mxu0 %v2969_v14 }
 0x295   :  { %806 = vmatprep.subr.mxu1 %v2967_v13  ;;  %2309 = vmatprep.subr.mxu0 %v3850_v56 }
 0x296   :  { %807 = vmatpush1.msra.mxu1 %v2971_v15  ;;  %2310 = vmatpush3.msra.mxu0 %v2977_v17 }
 0x297   :  { %808 = vmatprep.subr.mxu1 %v2974_v16  ;;  %2311 = vmatprep.subr.mxu0 %v3850_v56 }
 0x298   :  { %809 = vmatpush1.msra.mxu1 %v2980_v18  ;;  %2312 = vmatpush3.msra.mxu0 %v2987_v20 }
 0x299   :  { %810 = vmatprep.subr.mxu1 %v2984_v19  ;;  %2313 = vmatprep.subr.mxu0 %v3850_v56 }
 0x29a   :  { %811 = vmatpush1.msra.mxu1 %v2990_v21  ;;  %2314 = vmatpush3.msra.mxu0 %v2997_v23 }
 0x29b   :  { %812 = vmatprep.subr.mxu1 %v2994_v22  ;;  %2315 = vmatprep.subr.mxu0 %v3850_v56 }
 0x29c   :  { %813 = vmatpush1.msra.mxu1 %v3000_v24  ;;  %2316 = vmatpush3.msra.mxu0 %v3007_v26 }
 0x29d   :  { %814 = vmatprep.subr.mxu1 %v3004_v25  ;;  %2317 = vmatprep.subr.mxu0 %v3850_v56 }
 0x29e   :  { %815 = vmatpush1.msra.mxu1 %v3010_v27  ;;  %2318 = vmatpush3.msra.mxu0 %v3017_v29 }
 0x29f   :  { %816 = vmatprep.subr.mxu1 %v3014_v28  ;;  %2319 = vmatprep.subr.mxu0 %v3850_v56 }
 0x2a0   :  { %817 = vmatpush1.msra.mxu1 %v3020_v30  ;;  %2320 = vmatpush3.msra.mxu0 %v3027_v32 }
 0x2a1   :  { %818 = vmatprep.subr.mxu1 %v3024_v31  ;;  %2321 = vmatprep.subr.mxu0 %v3850_v56 }
 0x2a2   :  { %819 = vmatpush1.msra.mxu1 %v3030_v33  ;;  %2322 = vmatpush3.msra.mxu0 %v3037_v35 }
 0x2a3   :  { %820 = vmatprep.subr.mxu1 %v3034_v34  ;;  %2323 = vmatprep.subr.mxu0 %v3850_v56 }
 0x2a4   :  { %821 = vmatpush1.msra.mxu1 %v3040_v36  ;;  %2324 = vmatpush3.msra.mxu0 %v3047_v38 }
 0x2a5   :  { %822 = vmatprep.subr.mxu1 %v3044_v37  ;;  %2325 = vmatprep.subr.mxu0 %v3850_v56 }
 0x2a6   :  { %823 = vmatpush1.msra.mxu1 %v3050_v39  ;;  %2326 = vmatpush3.msra.mxu0 %v3057_v41 }
 0x2a7   :  { %824 = vmatprep.subr.mxu1 %v3054_v40  ;;  %2327 = vmatprep.subr.mxu0 %v3850_v56 }
 0x2a8   :  { %825 = vmatpush1.msra.mxu1 %v3060_v42  ;;  %2328 = vmatpush3.msra.mxu0 %v3067_v44 }
 0x2a9   :  { %826 = vmatprep.subr.mxu1 %v3064_v43  ;;  %2329 = vmatprep.subr.mxu0 %v3850_v56 }
 0x2aa   :  { %827 = vmatpush1.msra.mxu1 %v3070_v45  ;;  %2330 = vmatpush3.msra.mxu0 %v3077_v47 }
 0x2ab   :  { %828 = vmatprep.subr.mxu1 %v3074_v46  ;;  %2331 = vmatprep.subr.mxu0 %v3850_v56 }
 0x2ac   :  { %829 = vmatpush1.msra.mxu1 %v3080_v48  ;;  %2332 = vmatpush3.msra.mxu0 %v3087_v52 }
 0x2ad   :  { %830 = vmatprep.subr.mxu1 %v3084_v51  ;;  %2333 = vmatprep.subr.mxu0 %v3850_v56 }
 0x2ae   :  { %831 = vmatpush1.msra.mxu1 %v3090_v53  ;;  %2334 = vmatpush3.msra.mxu0 %v3097_v55 }
 0x2af   :  { %832 = vmatprep.subr.mxu1 %v3094_v54  ;;  %2335 = vmatprep.subr.mxu0 %v3850_v56  ;;  %v793_v54 = vrot.slane %v633_v2, 2 }
 0x2b0   :  { %833 = vmatpush1.msra.mxu1 %v3851_v57  ;;  %2336 = vmatpush3.msra.mxu0 %v3852_v58 }
 0x2b1   :  { %834 = vmatprep.subr.mxu1 %v3853_v60  ;;  %2337 = vmatprep.subr.mxu0 %v3850_v56 }
 0x2b2   :  { %835 = vmatpush1.msra.mxu1 %v3854_v61  ;;  %868 = vmatprep.mubr.f32.mxu1 %v3850_v56 }
 0x2b3   :  { %2338 = vmatpush3.msra.mxu0 %v3855_v0  ;;  %2339 = vmatprep.mubr.msk.f32.mxu0 %vm2839_vm0, %v3850_v56 }
 0x2b4   :  { %974 = vmatprep.subr.mxu1 %v3856_v49  ;;  %2342 = vmatprep.subr.mxu0 %v3850_v56 }
 0x353   :  { %v700_v5 = vpop.f32.mrf.mxu1  ;;  %v771_v63 = vpop.f32.mrf.mxu0 }
 0x354   :  { %v701_v62 = vadd.f32 %v700_v5, %v3857_v12  ;;  %v772_v57 = vadd.f32 %v771_v63, %v3213_v3 }
 0x355   :  { %v702_v7 = vpop.f32.mrf.mxu1  ;;  %v2306_v8 = vpop.f32.mrf.mxu0 }
 0x356   :  { %v775_v4 = vadd.f32 %v701_v62, %v633_v2  ;;  %v703_v50 = vadd.f32 %v702_v7, %v3209_v59  ;;  %v3865_v2 = vld [vmem:[#allocation28_spill] sm:$0xff] }
 0x358   :  { %v1965_v9 = vmul.f32 -1.442695, %v775_v4  ;;  %v785_v6 = vadd.f32 %v783_v1, %v703_v50 }
 0x35a   :  { %2577 = vpow2.f32 %v1965_v9  ;;  %v1966_v0 = vmul.f32 -1.442695, %v785_v6  ;;  %v803_v6 = vld [vmem:[#allocation2 + $0x2] ss:$8 sm:$0x7] }
 0x35c   :  { %2579 = vpow2.f32 %v1966_v0 }
 0x367   :  { %v2578_v61 = vpop.eup %2577 }
 0x368   :  { %v779_v49 = vadd.f32 1.0, %v2578_v61  ;;  %v3863_v61 = vld [vmem:[#allocation27_spill] sm:$0xff] }
 0x369   :  { %v2580_v60 = vpop.eup %2579 }
 0x36a   :  { %2581 = vrcp.f32 %v779_v49  ;;  %v789_v58 = vadd.f32 1.0, %v2580_v60  ;;  %v3862_v60 = vld [vmem:[#allocation26_spill] sm:$0xff]  ;;  %v3864_v49 = vld [vmem:[#allocation21_spill] sm:$0xff] }
 0x36c   :  { %2583 = vrcp.f32 %v789_v58  ;;  %v3861_v58 = vld [vmem:[#allocation24_spill] sm:$0xff] }
 0x377   :  { %v2582_v5 = vpop.eup %2581 }
 0x378   :  { %v792_v12 = vmul.f32 %v2582_v5, %v772_v57  ;;  %v3860_v57 = vld [vmem:[#allocation25_spill] sm:$0xff] }
 0x379   :  { %v2584_v8 = vpop.eup %2583 }
 0x37a   :  { %v795_v62 = vadd.f32 %v793_v54, %v792_v12  ;;  %v797_v7 = vsub.f32 1.0, %v2584_v8  ;;  %v799_v50 = vmul.f32 %v2584_v8, %v3217_v10  ;;  %v3858_v54 = vld [vmem:[#allocation22_spill] sm:$0xff]  ;;  %v3859_v10 = vld [vmem:[#allocation23_spill] sm:$0xff] }
 0x37c   :  { %2585 = vtanh.f32 %v795_v62 }
 0x389   :  { %v2586_v4 = vpop.eup %2585 }
 0x38a   :  { %v798_v9 = vmul.f32 %v2586_v4, %v797_v7 }
 0x38c   :  { %v3293_v0 = vadd.f32 %v799_v50, %v798_v9  ;;  %v953_v9 = vrot.slane %v803_v6, 1 }
 0x38e   :  { %801 = vst [vmem:[#allocation3 + $0x1] sm:$0x1] %v3293_v0  ;;  %869 = vmatmul.mubr.f32.vlgmr.msra.gmra.mxu1 %v3293_v0  ;;  %2340 = vmatmul.mubr.f32.vlgmr.msra.gmra.mxu0 %v3293_v0 }
 0x38f   :  { %975 = vmatpush1.msra.mxu1 %v2965_v11  ;;  %2343 = vmatpush3.msra.mxu0 %v2969_v14 }
 0x390   :  { %976 = vmatprep.subr.mxu1 %v2967_v13  ;;  %2344 = vmatprep.subr.mxu0 %v3850_v56 }
 0x391   :  { %977 = vmatpush1.msra.mxu1 %v2971_v15  ;;  %2345 = vmatpush3.msra.mxu0 %v2977_v17 }
 0x392   :  { %978 = vmatprep.subr.mxu1 %v2974_v16  ;;  %2346 = vmatprep.subr.mxu0 %v3850_v56 }
 0x393   :  { %979 = vmatpush1.msra.mxu1 %v2980_v18  ;;  %2347 = vmatpush3.msra.mxu0 %v2987_v20 }
 0x394   :  { %980 = vmatprep.subr.mxu1 %v2984_v19  ;;  %2348 = vmatprep.subr.mxu0 %v3850_v56 }
 0x395   :  { %981 = vmatpush1.msra.mxu1 %v2990_v21  ;;  %2349 = vmatpush3.msra.mxu0 %v2997_v23 }
 0x396   :  { %982 = vmatprep.subr.mxu1 %v2994_v22  ;;  %2350 = vmatprep.subr.mxu0 %v3850_v56 }
 0x397   :  { %983 = vmatpush1.msra.mxu1 %v3000_v24  ;;  %2351 = vmatpush3.msra.mxu0 %v3007_v26 }
 0x398   :  { %984 = vmatprep.subr.mxu1 %v3004_v25  ;;  %2352 = vmatprep.subr.mxu0 %v3850_v56 }
 0x399   :  { %985 = vmatpush1.msra.mxu1 %v3010_v27  ;;  %2353 = vmatpush3.msra.mxu0 %v3017_v29 }
 0x39a   :  { %986 = vmatprep.subr.mxu1 %v3014_v28  ;;  %2354 = vmatprep.subr.mxu0 %v3850_v56 }
 0x39b   :  { %987 = vmatpush1.msra.mxu1 %v3020_v30  ;;  %2355 = vmatpush3.msra.mxu0 %v3027_v32 }
 0x39c   :  { %988 = vmatprep.subr.mxu1 %v3024_v31  ;;  %2356 = vmatprep.subr.mxu0 %v3850_v56 }
 0x39d   :  { %989 = vmatpush1.msra.mxu1 %v3030_v33  ;;  %2357 = vmatpush3.msra.mxu0 %v3037_v35 }
 0x39e   :  { %990 = vmatprep.subr.mxu1 %v3034_v34  ;;  %2358 = vmatprep.subr.mxu0 %v3850_v56 }
 0x39f   :  { %991 = vmatpush1.msra.mxu1 %v3040_v36  ;;  %2359 = vmatpush3.msra.mxu0 %v3047_v38 }
 0x3a0   :  { %992 = vmatprep.subr.mxu1 %v3044_v37  ;;  %2360 = vmatprep.subr.mxu0 %v3850_v56 }
 0x3a1   :  { %993 = vmatpush1.msra.mxu1 %v3050_v39  ;;  %2361 = vmatpush3.msra.mxu0 %v3057_v41 }
 0x3a2   :  { %994 = vmatprep.subr.mxu1 %v3054_v40  ;;  %2362 = vmatprep.subr.mxu0 %v3850_v56 }
 0x3a3   :  { %995 = vmatpush1.msra.mxu1 %v3060_v42  ;;  %2363 = vmatpush3.msra.mxu0 %v3067_v44 }
 0x3a4   :  { %996 = vmatprep.subr.mxu1 %v3064_v43  ;;  %2364 = vmatprep.subr.mxu0 %v3850_v56 }
 0x3a5   :  { %997 = vmatpush1.msra.mxu1 %v3070_v45  ;;  %2365 = vmatpush3.msra.mxu0 %v3077_v47 }
 0x3a6   :  { %998 = vmatprep.subr.mxu1 %v3074_v46  ;;  %2366 = vmatprep.subr.mxu0 %v3850_v56 }
 0x3a7   :  { %999 = vmatpush1.msra.mxu1 %v3080_v48  ;;  %2367 = vmatpush3.msra.mxu0 %v3087_v52 }
 0x3a8   :  { %1000 = vmatprep.subr.mxu1 %v3084_v51  ;;  %2368 = vmatprep.subr.mxu0 %v3850_v56 }
 0x3a9   :  { %1001 = vmatpush1.msra.mxu1 %v3090_v53  ;;  %2369 = vmatpush3.msra.mxu0 %v3097_v55 }
 0x3aa   :  { %1002 = vmatprep.subr.mxu1 %v3858_v54  ;;  %2370 = vmatprep.subr.mxu0 %v3850_v56  ;;  %v963_v54 = vrot.slane %v803_v6, 2 }
 0x3ab   :  { %1003 = vmatpush1.msra.mxu1 %v3859_v10  ;;  %2371 = vmatpush3.msra.mxu0 %v3860_v57 }
 0x3ac   :  { %1004 = vmatprep.subr.mxu1 %v3861_v58  ;;  %2372 = vmatprep.subr.mxu0 %v3850_v56 }
 0x3ad   :  { %1005 = vmatpush1.msra.mxu1 %v3862_v60  ;;  %1038 = vmatprep.mubr.f32.mxu1 %v3850_v56 }
 0x3ae   :  { %2373 = vmatpush3.msra.mxu0 %v3863_v61  ;;  %2374 = vmatprep.mubr.msk.f32.mxu0 %vm2839_vm0, %v3850_v56 }
 0x3af   :  { %1144 = vmatprep.subr.mxu1 %v3864_v49  ;;  %2377 = vmatprep.subr.mxu0 %v3850_v56 }
 0x44e   :  { %v870_v63 = vpop.f32.mrf.mxu1  ;;  %v941_v12 = vpop.f32.mrf.mxu0 }
 0x44f   :  { %v871_v1 = vadd.f32 %v870_v63, %v3865_v2  ;;  %v942_v10 = vadd.f32 %v941_v12, %v3213_v3  ;;  %v3472_v12 = vld [vmem:[#allocation9 + $0x138] sm:$0xff] }
 0x450   :  { %v872_v5 = vpop.f32.mrf.mxu1  ;;  %v2341_v62 = vpop.f32.mrf.mxu0 }
 0x451   :  { %v945_v8 = vadd.f32 %v871_v1, %v803_v6  ;;  %v873_v4 = vadd.f32 %v872_v5, %v3209_v59  ;;  %v3478_v6 = vld [vmem:[#allocation9 + $0x128] sm:$0xff] }
 0x453   :  { %v1967_v7 = vmul.f32 -1.442695, %v945_v8  ;;  %v955_v50 = vadd.f32 %v953_v9, %v873_v4  ;;  %v3482_v9 = vld [vmem:[#allocation9 + $0x120] sm:$0xff] }
 0x455   :  { %2587 = vpow2.f32 %v1967_v7  ;;  %v1968_v61 = vmul.f32 -1.442695, %v955_v50  ;;  %v3485_v50 = vld [vmem:[#allocation9 + $0x130] sm:$0xff] }
 0x457   :  { %2589 = vpow2.f32 %v1968_v61 }
 0x462   :  { %v2588_v60 = vpop.eup %2587 }
 0x463   :  { %v949_v49 = vadd.f32 1.0, %v2588_v60  ;;  %v3468_v60 = vld [vmem:[#allocation9 + $0x140] sm:$0xff] }
 0x464   :  { %v2590_v58 = vpop.eup %2589 }
 0x465   :  { %2591 = vrcp.f32 %v949_v49  ;;  %v959_v57 = vadd.f32 1.0, %v2590_v58  ;;  %v3465_v58 = vld [vmem:[#allocation9 + $0x160] sm:$0xff]  ;;  %v3488_v49 = vld [vmem:[#allocation9 + $0x110] sm:$0xff] }
 0x467   :  { %2593 = vrcp.f32 %v959_v57  ;;  %v3462_v57 = vld [vmem:[#allocation9 + $0x150] sm:$0xff] }
 0x472   :  { %v2592_v63 = vpop.eup %2591 }
 0x473   :  { %v962_v2 = vmul.f32 %v2592_v63, %v942_v10  ;;  %v3458_v10 = vld [vmem:[#allocation9 + $0x158] sm:$0xff]  ;;  %v3492_v63 = vld [vmem:[#allocation9 + $0x108] sm:$0xff] }
 0x474   :  { %v2594_v62 = vpop.eup %2593 }
 0x475   :  { %v965_v1 = vadd.f32 %v963_v54, %v962_v2  ;;  %v967_v5 = vsub.f32 1.0, %v2594_v62  ;;  %v969_v4 = vmul.f32 %v2594_v62, %v3293_v0  ;;  %v3452_v0 = vld [vmem:[#allocation9 + $0x168] sm:$0xff]  ;;  %v3455_v54 = vld [vmem:[#allocation9 + $0x178] sm:$0xff] }
 0x476   :  { %v3475_v2 = vld [vmem:[#allocation9 + $0x148] sm:$0xff]  ;;  %v3498_v62 = vld [vmem:[#allocation9 + $0xf8] sm:$0xff] }
 0x477   :  { %2595 = vtanh.f32 %v965_v1  ;;  %v3495_v1 = vld [vmem:[#allocation9 + $0x118] sm:$0xff] }
 0x484   :  { %v2596_v8 = vpop.eup %2595 }
 0x485   :  { %v968_v7 = vmul.f32 %v2596_v8, %v967_v5  ;;  %v3502_v5 = vld [vmem:[#allocation9 + $0xf0] sm:$0xff]  ;;  %v3505_v8 = vld [vmem:[#allocation9 + $0x100] sm:$0xff] }
 0x487   :  { %v3369_v61 = vadd.f32 %v969_v4, %v968_v7  ;;  %v3508_v7 = vld [vmem:[#allocation9 + $0xe0] sm:$0xff]  ;;  %v3512_v4 = vld [vmem:[#allocation9 + $0xd8] sm:$0xff] }
 0x489   :  { %971 = vst [vmem:[#allocation3 + $0x2] sm:$0x1] %v3369_v61  ;;  %1039 = vmatmul.mubr.f32.vlgmr.msra.gmra.mxu1 %v3369_v61  ;;  %2375 = vmatmul.mubr.f32.vlgmr.msra.gmra.mxu0 %v3369_v61 }
 0x48a   :  { %1145 = vmatpush1.msra.mxu1 %v2965_v11  ;;  %2378 = vmatpush3.msra.mxu0 %v2969_v14  ;;  %v3866_v11 = vld [vmem:[#allocation22_spill] sm:$0xff]  ;;  %v3868_v14 = vld [vmem:[#allocation25_spill] sm:$0xff] }
 0x48b   :  { %1146 = vmatprep.subr.mxu1 %v2967_v13  ;;  %2379 = vmatprep.subr.mxu0 %v3850_v56  ;;  %v3867_v13 = vld [vmem:[#allocation23_spill] sm:$0xff] }
 0x48c   :  { %1147 = vmatpush1.msra.mxu1 %v2971_v15  ;;  %2380 = vmatpush3.msra.mxu0 %v2977_v17  ;;  %v3869_v15 = vld [vmem:[#allocation24_spill] sm:$0xff]  ;;  %v3871_v17 = vld [vmem:[#allocation27_spill] sm:$0xff] }
 0x48d   :  { %1148 = vmatprep.subr.mxu1 %v2974_v16  ;;  %2381 = vmatprep.subr.mxu0 %v3850_v56  ;;  %v3870_v16 = vld [vmem:[#allocation26_spill] sm:$0xff] }
 0x48e   :  { %1149 = vmatpush1.msra.mxu1 %v2980_v18  ;;  %2382 = vmatpush3.msra.mxu0 %v2987_v20  ;;  %v3439_v18 = vld [vmem:[#allocation9 + $0x170] sm:$0xff] }
 0x48f   :  { %1150 = vmatprep.subr.mxu1 %v2984_v19  ;;  %2383 = vmatprep.subr.mxu0 %v3850_v56 }
 0x490   :  { %1151 = vmatpush1.msra.mxu1 %v2990_v21  ;;  %2384 = vmatpush3.msra.mxu0 %v2997_v23  ;;  %v3872_v21 = vld [vmem:[#allocation28_spill] sm:$0xff] }
 0x491   :  { %1152 = vmatprep.subr.mxu1 %v2994_v22  ;;  %2385 = vmatprep.subr.mxu0 %v3850_v56  ;;  %v973_v23 = vld [vmem:[#allocation2 + $0x3] ss:$8 sm:$0x7] }
 0x492   :  { %1153 = vmatpush1.msra.mxu1 %v3000_v24  ;;  %2386 = vmatpush3.msra.mxu0 %v3007_v26 }
 0x493   :  { %1154 = vmatprep.subr.mxu1 %v3004_v25  ;;  %2387 = vmatprep.subr.mxu0 %v3850_v56 }
 0x494   :  { %1155 = vmatpush1.msra.mxu1 %v3010_v27  ;;  %2388 = vmatpush3.msra.mxu0 %v3017_v29  ;;  %v1123_v29 = vrot.slane %v973_v23, 1 }
 0x495   :  { %1156 = vmatprep.subr.mxu1 %v3014_v28  ;;  %2389 = vmatprep.subr.mxu0 %v3850_v56 }
 0x496   :  { %1157 = vmatpush1.msra.mxu1 %v3020_v30  ;;  %2390 = vmatpush3.msra.mxu0 %v3027_v32 }
 0x497   :  { %1158 = vmatprep.subr.mxu1 %v3024_v31  ;;  %2391 = vmatprep.subr.mxu0 %v3850_v56 }
 0x498   :  { %1159 = vmatpush1.msra.mxu1 %v3030_v33  ;;  %2392 = vmatpush3.msra.mxu0 %v3037_v35 }
 0x499   :  { %1160 = vmatprep.subr.mxu1 %v3034_v34  ;;  %2393 = vmatprep.subr.mxu0 %v3850_v56 }
 0x49a   :  { %1161 = vmatpush1.msra.mxu1 %v3040_v36  ;;  %2394 = vmatpush3.msra.mxu0 %v3047_v38 }
 0x49b   :  { %1162 = vmatprep.subr.mxu1 %v3044_v37  ;;  %2395 = vmatprep.subr.mxu0 %v3850_v56 }
 0x49c   :  { %1163 = vmatpush1.msra.mxu1 %v3050_v39  ;;  %2396 = vmatpush3.msra.mxu0 %v3057_v41  ;;  %v1133_v39 = vrot.slane %v973_v23, 2 }
 0x49d   :  { %1164 = vmatprep.subr.mxu1 %v3054_v40  ;;  %2397 = vmatprep.subr.mxu0 %v3850_v56 }
 0x49e   :  { %1165 = vmatpush1.msra.mxu1 %v3060_v42  ;;  %2398 = vmatpush3.msra.mxu0 %v3067_v44 }
 0x49f   :  { %1166 = vmatprep.subr.mxu1 %v3064_v43  ;;  %2399 = vmatprep.subr.mxu0 %v3850_v56 }
 0x4a0   :  { %1167 = vmatpush1.msra.mxu1 %v3070_v45  ;;  %2400 = vmatpush3.msra.mxu0 %v3077_v47 }
 0x4a1   :  { %1168 = vmatprep.subr.mxu1 %v3074_v46  ;;  %2401 = vmatprep.subr.mxu0 %v3850_v56 }
 0x4a2   :  { %1169 = vmatpush1.msra.mxu1 %v3080_v48  ;;  %2402 = vmatpush3.msra.mxu0 %v3087_v52 }
 0x4a3   :  { %1170 = vmatprep.subr.mxu1 %v3084_v51  ;;  %2403 = vmatprep.subr.mxu0 %v3850_v56 }
 0x4a4   :  { %1171 = vmatpush1.msra.mxu1 %v3090_v53  ;;  %2404 = vmatpush3.msra.mxu0 %v3097_v55 }
 0x4a5   :  { %1172 = vmatprep.subr.mxu1 %v3866_v11  ;;  %2405 = vmatprep.subr.mxu0 %v3850_v56 }
 0x4a6   :  { %1173 = vmatpush1.msra.mxu1 %v3867_v13  ;;  %2406 = vmatpush3.msra.mxu0 %v3868_v14 }
 0x4a7   :  { %1174 = vmatprep.subr.mxu1 %v3869_v15  ;;  %2407 = vmatprep.subr.mxu0 %v3850_v56 }
 0x4a8   :  { %1175 = vmatpush1.msra.mxu1 %v3870_v16  ;;  %1208 = vmatprep.mubr.f32.mxu1 %v3850_v56 }
 0x4a9   :  { %2408 = vmatpush3.msra.mxu0 %v3871_v17  ;;  %2409 = vmatprep.mubr.msk.f32.mxu0 %vm2839_vm0, %v3850_v56 }
 0x4aa   :  { %1314 = vmatprep.subr.mxu1 %v3439_v18  ;;  %2412 = vmatprep.subr.mxu0 %v3850_v56 }
 0x549   :  { %v1040_v19 = vpop.f32.mrf.mxu1  ;;  %v1111_v20 = vpop.f32.mrf.mxu0 }
 0x54a   :  { %v1041_v22 = vadd.f32 %v1040_v19, %v3872_v21  ;;  %v1112_v36 = vadd.f32 %v1111_v20, %v3213_v3  ;;  %v3518_v19 = vld [vmem:[#allocation9 + $0xc8] sm:$0xff]  ;;  %v3522_v20 = vld [vmem:[#allocation9 + $0xc0] sm:$0xff] }
 0x54b   :  { %v1042_v24 = vpop.f32.mrf.mxu1  ;;  %v2376_v25 = vpop.f32.mrf.mxu0 }
 0x54c   :  { %v1115_v26 = vadd.f32 %v1041_v22, %v973_v23  ;;  %v1043_v28 = vadd.f32 %v1042_v24, %v3209_v59  ;;  %v3525_v22 = vld [vmem:[#allocation9 + $0xd0] sm:$0xff]  ;;  %v3532_v24 = vld [vmem:[#allocation9 + $0xa8] sm:$0xff]  ;;  %v3535_v25 = vld [vmem:[#allocation9 + $0xb8] sm:$0xff] }
 0x54d   :  { %v3528_v23 = vld [vmem:[#allocation9 + $0xb0] sm:$0xff] }
 0x54e   :  { %v1969_v27 = vmul.f32 -1.442695, %v1115_v26  ;;  %v1125_v30 = vadd.f32 %v1123_v29, %v1043_v28  ;;  %v3538_v26 = vld [vmem:[#allocation9 + $0x98] sm:$0xff]  ;;  %v3545_v28 = vld [vmem:[#allocation9 + $0xa0] sm:$0xff] }
 0x54f   :  { %v3548_v29 = vld [vmem:[#allocation9 + $0x80] sm:$0xff] }
 0x550   :  { %2597 = vpow2.f32 %v1969_v27  ;;  %v1970_v31 = vmul.f32 -1.442695, %v1125_v30  ;;  %v3542_v27 = vld [vmem:[#allocation9 + $0x90] sm:$0xff]  ;;  %v3552_v30 = vld [vmem:[#allocation9 + $0x78] sm:$0xff] }
 0x552   :  { %2599 = vpow2.f32 %v1970_v31  ;;  %v3555_v31 = vld [vmem:[#allocation9 + $0x88] sm:$0xff] }
 0x55d   :  { %v2598_v32 = vpop.eup %2597 }
 0x55e   :  { %v1119_v33 = vadd.f32 1.0, %v2598_v32  ;;  %v3558_v32 = vld [vmem:[#allocation9 + $0x68] sm:$0xff] }
 0x55f   :  { %v2600_v34 = vpop.eup %2599 }
 0x560   :  { %2601 = vrcp.f32 %v1119_v33  ;;  %v1129_v35 = vadd.f32 1.0, %v2600_v34  ;;  %v3562_v33 = vld [vmem:[#allocation9 + $0x60] sm:$0xff]  ;;  %v3566_v34 = vld [vmem:[#allocation9 + $0x50] sm:$0xff] }
 0x562   :  { %2603 = vrcp.f32 %v1129_v35 }
 0x56d   :  { %v2602_v37 = vpop.eup %2601 }
 0x56e   :  { %v1132_v38 = vmul.f32 %v2602_v37, %v1112_v36 }
 0x56f   :  { %v2604_v41 = vpop.eup %2603 }
 0x570   :  { %v1135_v40 = vadd.f32 %v1133_v39, %v1132_v38  ;;  %v1137_v42 = vsub.f32 1.0, %v2604_v41  ;;  %v1139_v45 = vmul.f32 %v2604_v41, %v3369_v61  ;;  %v3515_v61 = vld [vmem:[#allocation9 + $0xe8] sm:$0xff] }
 0x572   :  { %2605 = vtanh.f32 %v1135_v40 }
 0x57f   :  { %v2606_v43 = vpop.eup %2605 }
 0x580   :  { %v1138_v44 = vmul.f32 %v2606_v43, %v1137_v42 }
 0x582   :  { %v3447_v46 = vadd.f32 %v1139_v45, %v1138_v44 }
 0x584   :  { %1141 = vst [vmem:[#allocation3 + $0x3] sm:$0x1] %v3447_v46  ;;  %1209 = vmatmul.mubr.f32.vlgmr.msra.gmra.mxu1 %v3447_v46  ;;  %2410 = vmatmul.mubr.f32.vlgmr.msra.gmra.mxu0 %v3447_v46 }
 0x585   :  { %1315 = vmatpush1.msra.mxu1 %v3452_v0  ;;  %2413 = vmatpush3.msra.mxu0 %v3455_v54 }
 0x586   :  { %1316 = vmatprep.subr.mxu1 %v3458_v10  ;;  %2414 = vmatprep.subr.mxu0 %v3850_v56 }
 0x587   :  { %1317 = vmatpush1.msra.mxu1 %v3462_v57  ;;  %2415 = vmatpush3.msra.mxu0 %v3465_v58 }
 0x588   :  { %1318 = vmatprep.subr.mxu1 %v3468_v60  ;;  %2416 = vmatprep.subr.mxu0 %v3850_v56 }
 0x589   :  { %1319 = vmatpush1.msra.mxu1 %v3472_v12  ;;  %2417 = vmatpush3.msra.mxu0 %v3475_v2 }
 0x58a   :  { %1320 = vmatprep.subr.mxu1 %v3478_v6  ;;  %2418 = vmatprep.subr.mxu0 %v3850_v56 }
 0x58b   :  { %1321 = vmatpush1.msra.mxu1 %v3482_v9  ;;  %2419 = vmatpush3.msra.mxu0 %v3485_v50 }
 0x58c   :  { %1322 = vmatprep.subr.mxu1 %v3488_v49  ;;  %2420 = vmatprep.subr.mxu0 %v3850_v56 }
 0x58d   :  { %1323 = vmatpush1.msra.mxu1 %v3492_v63  ;;  %2421 = vmatpush3.msra.mxu0 %v3495_v1 }
 0x58e   :  { %1324 = vmatprep.subr.mxu1 %v3498_v62  ;;  %2422 = vmatprep.subr.mxu0 %v3850_v56 }
 0x58f   :  { %1325 = vmatpush1.msra.mxu1 %v3502_v5  ;;  %2423 = vmatpush3.msra.mxu0 %v3505_v8 }
 0x590   :  { %1326 = vmatprep.subr.mxu1 %v3508_v7  ;;  %2424 = vmatprep.subr.mxu0 %v3850_v56 }
 0x591   :  { %1327 = vmatpush1.msra.mxu1 %v3512_v4  ;;  %2425 = vmatpush3.msra.mxu0 %v3515_v61 }
 0x592   :  { %1328 = vmatprep.subr.mxu1 %v3518_v19  ;;  %2426 = vmatprep.subr.mxu0 %v3850_v56 }
 0x593   :  { %1329 = vmatpush1.msra.mxu1 %v3522_v20  ;;  %2427 = vmatpush3.msra.mxu0 %v3525_v22 }
 0x594   :  { %1330 = vmatprep.subr.mxu1 %v3528_v23  ;;  %2428 = vmatprep.subr.mxu0 %v3850_v56 }
 0x595   :  { %1331 = vmatpush1.msra.mxu1 %v3532_v24  ;;  %2429 = vmatpush3.msra.mxu0 %v3535_v25 }
 0x596   :  { %1332 = vmatprep.subr.mxu1 %v3538_v26  ;;  %2430 = vmatprep.subr.mxu0 %v3850_v56 }
 0x597   :  { %1333 = vmatpush1.msra.mxu1 %v3542_v27  ;;  %2431 = vmatpush3.msra.mxu0 %v3545_v28 }
 0x598   :  { %1334 = vmatprep.subr.mxu1 %v3548_v29  ;;  %2432 = vmatprep.subr.mxu0 %v3850_v56 }
 0x599   :  { %1335 = vmatpush1.msra.mxu1 %v3552_v30  ;;  %2433 = vmatpush3.msra.mxu0 %v3555_v31 }
 0x59a   :  { %1336 = vmatprep.subr.mxu1 %v3558_v32  ;;  %2434 = vmatprep.subr.mxu0 %v3850_v56 }
 0x59b   :  { %1337 = vmatpush1.msra.mxu1 %v3562_v33  ;;  %2435 = vmatpush3.msra.mxu0 %v3077_v47 }
 0x59c   :  { %1338 = vmatprep.subr.mxu1 %v3566_v34  ;;  %2436 = vmatprep.subr.mxu0 %v3850_v56 }
 0x59d   :  { %1339 = vmatpush1.msra.mxu1 %v3080_v48  ;;  %2437 = vmatpush3.msra.mxu0 %v3087_v52  ;;  %v1143_v52 = vld [vmem:[#allocation2 + $0x4] ss:$8 sm:$0x7] }
 0x59e   :  { %1340 = vmatprep.subr.mxu1 %v3084_v51  ;;  %2438 = vmatprep.subr.mxu0 %v3850_v56  ;;  %v1303_v42 = vrot.slane %v1143_v52, 2 }
 0x59f   :  { %1341 = vmatpush1.msra.mxu1 %v3090_v53  ;;  %2439 = vmatpush3.msra.mxu0 %v3097_v55 }
 0x5a0   :  { %1342 = vmatprep.subr.mxu1 %v3866_v11  ;;  %2440 = vmatprep.subr.mxu0 %v3850_v56 }
 0x5a1   :  { %1343 = vmatpush1.msra.mxu1 %v3867_v13  ;;  %2441 = vmatpush3.msra.mxu0 %v3868_v14 }
 0x5a2   :  { %1344 = vmatprep.subr.mxu1 %v3869_v15  ;;  %2442 = vmatprep.subr.mxu0 %v3850_v56  ;;  %v1293_v15 = vrot.slane %v1143_v52, 1 }
 0x5a3   :  { %1345 = vmatpush1.msra.mxu1 %v3870_v16  ;;  %1378 = vmatprep.mubr.f32.mxu1 %v3850_v56 }
 0x5a4   :  { %2443 = vmatpush3.msra.mxu0 %v3871_v17  ;;  %2444 = vmatprep.mubr.msk.f32.mxu0 %vm2839_vm0, %v3850_v56 }
 0x5a5   :  { %1484 = vmatprep.subr.mxu1 %v3439_v18  ;;  %2447 = vmatprep.subr.mxu0 %v3850_v56 }
 0x644   :  { %v1210_v47 = vpop.f32.mrf.mxu1  ;;  %v1281_v48 = vpop.f32.mrf.mxu0 }
 0x645   :  { %v1211_v51 = vadd.f32 %v1210_v47, %v3872_v21  ;;  %v1282_v39 = vadd.f32 %v1281_v48, %v3213_v3  ;;  %v3648_v48 = vld [vmem:[#allocation9 + $0x48] sm:$0xff] }
 0x646   :  { %v1212_v53 = vpop.f32.mrf.mxu1  ;;  %v2411_v55 = vpop.f32.mrf.mxu0 }
 0x647   :  { %v1285_v11 = vadd.f32 %v1211_v51, %v1143_v52  ;;  %v1213_v14 = vadd.f32 %v1212_v53, %v3209_v59  ;;  %v3651_v52 = vld [vmem:[#allocation9 + $0x58] sm:$0xff] }
 0x649   :  { %v1971_v13 = vmul.f32 -1.442695, %v1285_v11  ;;  %v1295_v16 = vadd.f32 %v1293_v15, %v1213_v14  ;;  %v3654_v11 = vld [vmem:[#allocation9 + $0x38] sm:$0xff]  ;;  %v3661_v14 = vld [vmem:[#allocation9 + $0x40] sm:$0xff] }
 0x64a   :  { %v3664_v15 = vld [vmem:[#allocation9 + $0x20] sm:$0xff] }
 0x64b   :  { %2607 = vpow2.f32 %v1971_v13  ;;  %v1972_v17 = vmul.f32 -1.442695, %v1295_v16  ;;  %v3658_v13 = vld [vmem:[#allocation9 + $0x30] sm:$0xff]  ;;  %3873 = vst [vmem:[#allocation21_spill] sm:$0xff] %v3664_v15  ;;  %v3668_v16 = vld [vmem:[#allocation9 + $0x18] sm:$0xff] }
 0x64c   :  { %3874 = vst [vmem:[#allocation22_spill] sm:$0xff] %v3668_v16 }
 0x64d   :  { %2609 = vpow2.f32 %v1972_v17  ;;  %v3671_v17 = vld [vmem:[#allocation9 + $0x28] sm:$0xff] }
 0x64e   :  { %3875 = vst [vmem:[#allocation23_spill] sm:$0xff] %v3671_v17 }
 0x658   :  { %v2608_v35 = vpop.eup %2607 }
 0x659   :  { %v1289_v36 = vadd.f32 1.0, %v2608_v35  ;;  %v3674_v35 = vld [vmem:[#allocation9 + $0x8] sm:$0xff] }
 0x65a   :  { %v2610_v37 = vpop.eup %2609  ;;  %3876 = vst [vmem:[#allocation25_spill] sm:$0xff] %v3674_v35 }
 0x65b   :  { %2611 = vrcp.f32 %v1289_v36  ;;  %v1299_v38 = vadd.f32 1.0, %v2610_v37  ;;  %v3678_v36 = vld [vmem:[#allocation9] sm:$0xff]  ;;  %v3682_v37 = vld [vmem:[#allocation9 + $0x10] sm:$0xff] }
 0x65c   :  { %3877 = vst [vmem:[#allocation24_spill] sm:$0xff] %v3678_v36  ;;  %3878 = vst [vmem:[#allocation26_spill] sm:$0xff] %v3682_v37 }
 0x65d   :  { %2613 = vrcp.f32 %v1299_v38 }
 0x668   :  { %v2612_v40 = vpop.eup %2611 }
 0x669   :  { %v1302_v41 = vmul.f32 %v2612_v40, %v1282_v39 }
 0x66a   :  { %v2614_v44 = vpop.eup %2613 }
 0x66b   :  { %v1305_v43 = vadd.f32 %v1303_v42, %v1302_v41  ;;  %v1307_v45 = vsub.f32 1.0, %v2614_v44  ;;  %v1309_v53 = vmul.f32 %v2614_v44, %v3447_v46  ;;  %v3643_v46 = vld [vmem:[#allocation9 + $0x70] sm:$0xff] }
 0x66c   :  { %v1313_v41 = vld [vmem:[#allocation2 + $0x5] ss:$8 sm:$0x7] }
 0x66d   :  { %2615 = vtanh.f32 %v1305_v43 }
 0x67a   :  { %v2616_v47 = vpop.eup %2615 }
 0x67b   :  { %v1308_v51 = vmul.f32 %v2616_v47, %v1307_v45 }
 0x67d   :  { %v3593_v55 = vadd.f32 %v1309_v53, %v1308_v51  ;;  %v1463_v51 = vrot.slane %v1313_v41, 1 }
 0x67f   :  { %1311 = vst [vmem:[#allocation3 + $0x4] sm:$0x1] %v3593_v55  ;;  %1379 = vmatmul.mubr.f32.vlgmr.msra.gmra.mxu1 %v3593_v55  ;;  %2445 = vmatmul.mubr.f32.vlgmr.msra.gmra.mxu0 %v3593_v55 }
 0x680   :  { %1485 = vmatpush1.msra.mxu1 %v3452_v0  ;;  %2448 = vmatpush3.msra.mxu0 %v3455_v54 }
 0x681   :  { %1486 = vmatprep.subr.mxu1 %v3458_v10  ;;  %2449 = vmatprep.subr.mxu0 %v3850_v56 }
 0x682   :  { %1487 = vmatpush1.msra.mxu1 %v3462_v57  ;;  %2450 = vmatpush3.msra.mxu0 %v3465_v58 }
 0x683   :  { %1488 = vmatprep.subr.mxu1 %v3468_v60  ;;  %2451 = vmatprep.subr.mxu0 %v3850_v56 }
 0x684   :  { %1489 = vmatpush1.msra.mxu1 %v3472_v12  ;;  %2452 = vmatpush3.msra.mxu0 %v3475_v2 }
 0x685   :  { %1490 = vmatprep.subr.mxu1 %v3478_v6  ;;  %2453 = vmatprep.subr.mxu0 %v3850_v56 }
 0x686   :  { %1491 = vmatpush1.msra.mxu1 %v3482_v9  ;;  %2454 = vmatpush3.msra.mxu0 %v3485_v50 }
 0x687   :  { %1492 = vmatprep.subr.mxu1 %v3488_v49  ;;  %2455 = vmatprep.subr.mxu0 %v3850_v56 }
 0x688   :  { %1493 = vmatpush1.msra.mxu1 %v3492_v63  ;;  %2456 = vmatpush3.msra.mxu0 %v3495_v1 }
 0x689   :  { %1494 = vmatprep.subr.mxu1 %v3498_v62  ;;  %2457 = vmatprep.subr.mxu0 %v3850_v56 }
 0x68a   :  { %1495 = vmatpush1.msra.mxu1 %v3502_v5  ;;  %2458 = vmatpush3.msra.mxu0 %v3505_v8 }
 0x68b   :  { %1496 = vmatprep.subr.mxu1 %v3508_v7  ;;  %2459 = vmatprep.subr.mxu0 %v3850_v56 }
 0x68c   :  { %1497 = vmatpush1.msra.mxu1 %v3512_v4  ;;  %2460 = vmatpush3.msra.mxu0 %v3515_v61 }
 0x68d   :  { %1498 = vmatprep.subr.mxu1 %v3518_v19  ;;  %2461 = vmatprep.subr.mxu0 %v3850_v56 }
 0x68e   :  { %1499 = vmatpush1.msra.mxu1 %v3522_v20  ;;  %2462 = vmatpush3.msra.mxu0 %v3525_v22 }
 0x68f   :  { %1500 = vmatprep.subr.mxu1 %v3528_v23  ;;  %2463 = vmatprep.subr.mxu0 %v3850_v56 }
 0x690   :  { %1501 = vmatpush1.msra.mxu1 %v3532_v24  ;;  %2464 = vmatpush3.msra.mxu0 %v3535_v25 }
 0x691   :  { %1502 = vmatprep.subr.mxu1 %v3538_v26  ;;  %2465 = vmatprep.subr.mxu0 %v3850_v56 }
 0x692   :  { %1503 = vmatpush1.msra.mxu1 %v3542_v27  ;;  %2466 = vmatpush3.msra.mxu0 %v3545_v28 }
 0x693   :  { %1504 = vmatprep.subr.mxu1 %v3548_v29  ;;  %2467 = vmatprep.subr.mxu0 %v3850_v56 }
 0x694   :  { %1505 = vmatpush1.msra.mxu1 %v3552_v30  ;;  %2468 = vmatpush3.msra.mxu0 %v3555_v31 }
 0x695   :  { %1506 = vmatprep.subr.mxu1 %v3558_v32  ;;  %2469 = vmatprep.subr.mxu0 %v3850_v56 }
 0x696   :  { %1507 = vmatpush1.msra.mxu1 %v3562_v33  ;;  %2470 = vmatpush3.msra.mxu0 %v3643_v46 }
 0x697   :  { %1508 = vmatprep.subr.mxu1 %v3566_v34  ;;  %2471 = vmatprep.subr.mxu0 %v3850_v56 }
 0x698   :  { %1509 = vmatpush1.msra.mxu1 %v3648_v48  ;;  %2472 = vmatpush3.msra.mxu0 %v3651_v52 }
 0x699   :  { %1510 = vmatprep.subr.mxu1 %v3654_v11  ;;  %2473 = vmatprep.subr.mxu0 %v3850_v56 }
 0x69a   :  { %1511 = vmatpush1.msra.mxu1 %v3658_v13  ;;  %2474 = vmatpush3.msra.mxu0 %v3661_v14 }
 0x69b   :  { %1512 = vmatprep.subr.mxu1 %v3664_v15  ;;  %2475 = vmatprep.subr.mxu0 %v3850_v56  ;;  %v1473_v15 = vrot.slane %v1313_v41, 2 }
 0x69c   :  { %1513 = vmatpush1.msra.mxu1 %v3668_v16  ;;  %2476 = vmatpush3.msra.mxu0 %v3671_v17 }
 0x69d   :  { %1514 = vmatprep.subr.mxu1 %v3674_v35  ;;  %2477 = vmatprep.subr.mxu0 %v3850_v56 }
 0x69e   :  { %1515 = vmatpush1.msra.mxu1 %v3678_v36  ;;  %1548 = vmatprep.mubr.f32.mxu1 %v3850_v56 }
 0x69f   :  { %2478 = vmatpush3.msra.mxu0 %v3682_v37  ;;  %2479 = vmatprep.mubr.msk.f32.mxu0 %vm2839_vm0, %v3850_v56 }
 0x6a0   :  { %1654 = vmatprep.subr.mxu1 %v3439_v18  ;;  %2482 = vmatprep.subr.mxu0 %v3850_v56 }
 0x73f   :  { %v1380_v38 = vpop.f32.mrf.mxu1  ;;  %v1451_v39 = vpop.f32.mrf.mxu0 }
 0x740   :  { %v1381_v40 = vadd.f32 %v1380_v38, %v3872_v21  ;;  %v1452_v16 = vadd.f32 %v1451_v39, %v3213_v3  ;;  %v1825_v39 = vld [vmem:[#allocation10 + $0x8] sm:$0xff] }
 0x741   :  { %v1382_v42 = vpop.f32.mrf.mxu1  ;;  %v2446_v43 = vpop.f32.mrf.mxu0 }
 0x742   :  { %v1455_v44 = vadd.f32 %v1381_v40, %v1313_v41  ;;  %v1383_v47 = vadd.f32 %v1382_v42, %v3209_v59  ;;  %v1824_v41 = vld [vmem:[#allocation10] sm:$0xff] }
 0x744   :  { %v1973_v45 = vmul.f32 -1.442695, %v1455_v44  ;;  %v1465_v53 = vadd.f32 %v1463_v51, %v1383_v47 }
 0x746   :  { %2617 = vpow2.f32 %v1973_v45  ;;  %v1974_v37 = vmul.f32 -1.442695, %v1465_v53 }
 0x748   :  { %2619 = vpow2.f32 %v1974_v37 }
 0x753   :  { %v2618_v36 = vpop.eup %2617 }
 0x754   :  { %v1459_v18 = vadd.f32 1.0, %v2618_v36  ;;  %v1826_v36 = vld [vmem:[#allocation10 + $0x10] sm:$0xff] }
 0x755   :  { %v2620_v35 = vpop.eup %2619 }
 0x756   :  { %2621 = vrcp.f32 %v1459_v18  ;;  %v1469_v17 = vadd.f32 1.0, %v2620_v35  ;;  %v1827_v35 = vld [vmem:[#allocation10 + $0x18] sm:$0xff] }
 0x758   :  { %2623 = vrcp.f32 %v1469_v17  ;;  %v1828_v17 = vld [vmem:[#allocation10 + $0x20] sm:$0xff] }
 0x763   :  { %v2622_v38 = vpop.eup %2621 }
 0x764   :  { %v1472_v21 = vmul.f32 %v2622_v38, %v1452_v16  ;;  %v1829_v16 = vld [vmem:[#allocation10 + $0x28] sm:$0xff] }
 0x765   :  { %v2624_v43 = vpop.eup %2623  ;;  %v1653_v38 = vld [vmem:[#allocation2 + $0x7] ss:$8 sm:$0x7] }
 0x766   :  { %v1475_v40 = vadd.f32 %v1473_v15, %v1472_v21  ;;  %v1477_v42 = vsub.f32 1.0, %v2624_v43  ;;  %v1479_v47 = vmul.f32 %v2624_v43, %v3593_v55  ;;  %v3879_v21 = vld [vmem:[#allocation21_spill] sm:$0xff]  ;;  %v1837_v55 = vld [vmem:[#allocation10 + $0x68] sm:$0xff] }
 0x767   :  { %v1830_v15 = vld [vmem:[#allocation10 + $0x30] sm:$0xff] }
 0x768   :  { %2625 = vtanh.f32 %v1475_v40 }
 0x775   :  { %v2626_v44 = vpop.eup %2625 }
 0x776   :  { %v1478_v45 = vmul.f32 %v2626_v44, %v1477_v42 }
 0x778   :  { %v3693_v37 = vadd.f32 %v1479_v47, %v1478_v45  ;;  %v1803_v47 = vrot.slane %v1653_v38, 1 }
 0x77a   :  { %1481 = vst [vmem:[#allocation3 + $0x5] sm:$0x1] %v3693_v37  ;;  %1549 = vmatmul.mubr.f32.vlgmr.msra.gmra.mxu1 %v3693_v37  ;;  %2480 = vmatmul.mubr.f32.vlgmr.msra.gmra.mxu0 %v3693_v37 }
 0x77b   :  { %1655 = vmatpush1.msra.mxu1 %v3452_v0  ;;  %2483 = vmatpush3.msra.mxu0 %v3455_v54  ;;  %v3880_v0 = vld [vmem:[#allocation22_spill] sm:$0xff]  ;;  %v3881_v54 = vld [vmem:[#allocation23_spill] sm:$0xff] }
 0x77c   :  { %1656 = vmatprep.subr.mxu1 %v3458_v10  ;;  %2484 = vmatprep.subr.mxu0 %v3850_v56  ;;  %v3882_v10 = vld [vmem:[#allocation25_spill] sm:$0xff] }
 0x77d   :  { %1657 = vmatpush1.msra.mxu1 %v3462_v57  ;;  %2485 = vmatpush3.msra.mxu0 %v3465_v58  ;;  %v3883_v57 = vld [vmem:[#allocation24_spill] sm:$0xff]  ;;  %v3884_v58 = vld [vmem:[#allocation26_spill] sm:$0xff] }
 0x77e   :  { %1658 = vmatprep.subr.mxu1 %v3468_v60  ;;  %2486 = vmatprep.subr.mxu0 %v3850_v56 }
 0x77f   :  { %1659 = vmatpush1.msra.mxu1 %v3472_v12  ;;  %2487 = vmatpush3.msra.mxu0 %v3475_v2  ;;  %v3885_v2 = vld [vmem:[#allocation28_spill] sm:$0xff] }
 0x780   :  { %1660 = vmatprep.subr.mxu1 %v3478_v6  ;;  %2488 = vmatprep.subr.mxu0 %v3850_v56 }
 0x781   :  { %1661 = vmatpush1.msra.mxu1 %v3482_v9  ;;  %2489 = vmatpush3.msra.mxu0 %v3485_v50  ;;  %v1483_v9 = vld [vmem:[#allocation2 + $0x6] ss:$8 sm:$0x7] }
 0x782   :  { %1662 = vmatprep.subr.mxu1 %v3488_v49  ;;  %2490 = vmatprep.subr.mxu0 %v3850_v56 }
 0x783   :  { %1663 = vmatpush1.msra.mxu1 %v3492_v63  ;;  %2491 = vmatpush3.msra.mxu0 %v3495_v1 }
 0x784   :  { %1664 = vmatprep.subr.mxu1 %v3498_v62  ;;  %2492 = vmatprep.subr.mxu0 %v3850_v56 }
 0x785   :  { %1665 = vmatpush1.msra.mxu1 %v3502_v5  ;;  %2493 = vmatpush3.msra.mxu0 %v3505_v8  ;;  %v1633_v5 = vrot.slane %v1483_v9, 1 }
 0x786   :  { %1666 = vmatprep.subr.mxu1 %v3508_v7  ;;  %2494 = vmatprep.subr.mxu0 %v3850_v56 }
 0x787   :  { %1667 = vmatpush1.msra.mxu1 %v3512_v4  ;;  %2495 = vmatpush3.msra.mxu0 %v3515_v61 }
 0x788   :  { %1668 = vmatprep.subr.mxu1 %v3518_v19  ;;  %2496 = vmatprep.subr.mxu0 %v3850_v56 }
 0x789   :  { %1669 = vmatpush1.msra.mxu1 %v3522_v20  ;;  %2497 = vmatpush3.msra.mxu0 %v3525_v22 }
 0x78a   :  { %1670 = vmatprep.subr.mxu1 %v3528_v23  ;;  %2498 = vmatprep.subr.mxu0 %v3850_v56 }
 0x78b   :  { %1671 = vmatpush1.msra.mxu1 %v3532_v24  ;;  %2499 = vmatpush3.msra.mxu0 %v3535_v25  ;;  %v1643_v25 = vrot.slane %v1483_v9, 2 }
 0x78c   :  { %1672 = vmatprep.subr.mxu1 %v3538_v26  ;;  %2500 = vmatprep.subr.mxu0 %v3850_v56 }
 0x78d   :  { %1673 = vmatpush1.msra.mxu1 %v3542_v27  ;;  %2501 = vmatpush3.msra.mxu0 %v3545_v28 }
 0x78e   :  { %1674 = vmatprep.subr.mxu1 %v3548_v29  ;;  %2502 = vmatprep.subr.mxu0 %v3850_v56 }
 0x78f   :  { %1675 = vmatpush1.msra.mxu1 %v3552_v30  ;;  %2503 = vmatpush3.msra.mxu0 %v3555_v31 }
 0x790   :  { %1676 = vmatprep.subr.mxu1 %v3558_v32  ;;  %2504 = vmatprep.subr.mxu0 %v3850_v56 }
 0x791   :  { %1677 = vmatpush1.msra.mxu1 %v3562_v33  ;;  %2505 = vmatpush3.msra.mxu0 %v3643_v46  ;;  %v1839_v33 = vld [vmem:[#allocation10 + $0x78] sm:$0xff]  ;;  %v1836_v46 = vld [vmem:[#allocation10 + $0x60] sm:$0xff] }
 0x792   :  { %1678 = vmatprep.subr.mxu1 %v3566_v34  ;;  %2506 = vmatprep.subr.mxu0 %v3850_v56  ;;  %v1838_v34 = vld [vmem:[#allocation10 + $0x70] sm:$0xff] }
 0x793   :  { %1679 = vmatpush1.msra.mxu1 %v3648_v48  ;;  %2507 = vmatpush3.msra.mxu0 %v3651_v52  ;;  %v1835_v48 = vld [vmem:[#allocation10 + $0x58] sm:$0xff]  ;;  %v1834_v52 = vld [vmem:[#allocation10 + $0x50] sm:$0xff] }
 0x794   :  { %1680 = vmatprep.subr.mxu1 %v3654_v11  ;;  %2508 = vmatprep.subr.mxu0 %v3850_v56  ;;  %v1833_v11 = vld [vmem:[#allocation10 + $0x48] sm:$0xff] }
 0x795   :  { %1681 = vmatpush1.msra.mxu1 %v3658_v13  ;;  %2509 = vmatpush3.msra.mxu0 %v3661_v14  ;;  %v1832_v13 = vld [vmem:[#allocation10 + $0x40] sm:$0xff]  ;;  %v1831_v14 = vld [vmem:[#allocation10 + $0x38] sm:$0xff] }
 0x796   :  { %1682 = vmatprep.subr.mxu1 %v3879_v21  ;;  %2510 = vmatprep.subr.mxu0 %v3850_v56 }
 0x797   :  { %1683 = vmatpush1.msra.mxu1 %v3880_v0  ;;  %2511 = vmatpush3.msra.mxu0 %v3881_v54 }
 0x798   :  { %1684 = vmatprep.subr.mxu1 %v3882_v10  ;;  %2512 = vmatprep.subr.mxu0 %v3850_v56 }
 0x799   :  { %1685 = vmatpush1.msra.mxu1 %v3883_v57  ;;  %1718 = vmatprep.mubr.f32.mxu1 %v3850_v56 }
 0x79a   :  { %2513 = vmatpush3.msra.mxu0 %v3884_v58  ;;  %2514 = vmatprep.mubr.msk.f32.mxu0 %vm2839_vm0, %v3850_v56 }
 0x79b   :  { %2517 = vmatprep.subr.mxu1 %v3850_v56 }
 0x83a   :  { %v1550_v60 = vpop.f32.mrf.mxu1  ;;  %v1621_v12 = vpop.f32.mrf.mxu0 }
 0x83b   :  { %v1551_v6 = vadd.f32 %v1550_v60, %v3885_v2  ;;  %v1622_v22 = vadd.f32 %v1621_v12, %v3213_v3  ;;  %v1813_v12 = vrot.slane %v1653_v38, 2 }
 0x83c   :  { %v1552_v50 = vpop.f32.mrf.mxu1  ;;  %v2481_v49 = vpop.f32.mrf.mxu0 }
 0x83d   :  { %v1625_v63 = vadd.f32 %v1551_v6, %v1483_v9  ;;  %v1553_v62 = vadd.f32 %v1552_v50, %v3209_v59 }
 0x83f   :  { %v1975_v1 = vmul.f32 -1.442695, %v1625_v63  ;;  %v1635_v8 = vadd.f32 %v1633_v5, %v1553_v62  ;;  %v3886_v5 = vld [vmem:[#allocation20_spill] sm:$0xff] }
 0x840   :  { %vm1917_vm2 = vcmp.lt.s32.totalorder %v3886_v5, 64 }
 0x841   :  { %2627 = vpow2.f32 %v1975_v1  ;;  %v1976_v7 = vmul.f32 -1.442695, %v1635_v8 }
 0x843   :  { %2629 = vpow2.f32 %v1976_v7 }
 0x84e   :  { %v2628_v4 = vpop.eup %2627 }
 0x84f   :  { %v1629_v61 = vadd.f32 1.0, %v2628_v4 }
 0x850   :  { %v2630_v19 = vpop.eup %2629 }
 0x851   :  { %2631 = vrcp.f32 %v1629_v61  ;;  %v1639_v20 = vadd.f32 1.0, %v2630_v19 }
 0x853   :  { %2633 = vrcp.f32 %v1639_v20 }
 0x85e   :  { %v2632_v23 = vpop.eup %2631 }
 0x85f   :  { %v1642_v24 = vmul.f32 %v2632_v23, %v1622_v22 }
 0x860   :  { %v2634_v27 = vpop.eup %2633 }
 0x861   :  { %v1645_v26 = vadd.f32 %v1643_v25, %v1642_v24  ;;  %v1647_v28 = vsub.f32 1.0, %v2634_v27  ;;  %v1649_v31 = vmul.f32 %v2634_v27, %v3693_v37 }
 0x863   :  { %2635 = vtanh.f32 %v1645_v26 }
 0x870   :  { %v2636_v29 = vpop.eup %2635 }
 0x871   :  { %v1648_v30 = vmul.f32 %v2636_v29, %v1647_v28 }
 0x873   :  { %v3768_v32 = vadd.f32 %v1649_v31, %v1648_v30 }
 0x875   :  { %1651 = vst [vmem:[#allocation3 + $0x6] sm:$0x1] %v3768_v32  ;;  %1719 = vmatmul.mubr.f32.vlgmr.msra.gmra.mxu1 %v3768_v32  ;;  %2515 = vmatmul.mubr.f32.vlgmr.msra.gmra.mxu0 %v3768_v32 }
 0x876   :  { %2549 = vmatprep.mubr.msk.f32.mxu1 %vm2839_vm0, %v3850_v56  ;;  %2518 = vmatpush3.msra.mxu1 %v1839_v33 }
 0x877   :  { %2519 = vmatprep.subr.mxu1 %v3850_v56 }
 0x878   :  { %2520 = vmatpush3.msra.mxu1 %v1838_v34 }
 0x879   :  { %2521 = vmatprep.subr.mxu1 %v3850_v56 }
 0x87a   :  { %2522 = vmatpush3.msra.mxu1 %v1837_v55 }
 0x87b   :  { %2523 = vmatprep.subr.mxu1 %v3850_v56 }
 0x87c   :  { %2524 = vmatpush3.msra.mxu1 %v1836_v46 }
 0x87d   :  { %2525 = vmatprep.subr.mxu1 %v3850_v56 }
 0x87e   :  { %2526 = vmatpush3.msra.mxu1 %v1835_v48 }
 0x87f   :  { %2527 = vmatprep.subr.mxu1 %v3850_v56 }
 0x880   :  { %2528 = vmatpush3.msra.mxu1 %v1834_v52 }
 0x881   :  { %2529 = vmatprep.subr.mxu1 %v3850_v56 }
 0x882   :  { %2530 = vmatpush3.msra.mxu1 %v1833_v11 }
 0x883   :  { %2531 = vmatprep.subr.mxu1 %v3850_v56 }
 0x884   :  { %2532 = vmatpush3.msra.mxu1 %v1832_v13 }
 0x885   :  { %2533 = vmatprep.subr.mxu1 %v3850_v56 }
 0x886   :  { %2534 = vmatpush3.msra.mxu1 %v1831_v14 }
 0x887   :  { %2535 = vmatprep.subr.mxu1 %v3850_v56 }
 0x888   :  { %2536 = vmatpush3.msra.mxu1 %v1830_v15 }
 0x889   :  { %2537 = vmatprep.subr.mxu1 %v3850_v56 }
 0x88a   :  { %2538 = vmatpush3.msra.mxu1 %v1829_v16 }
 0x88b   :  { %2539 = vmatprep.subr.mxu1 %v3850_v56 }
 0x88c   :  { %2540 = vmatpush3.msra.mxu1 %v1828_v17 }
 0x88d   :  { %2541 = vmatprep.subr.mxu1 %v3850_v56 }
 0x88e   :  { %2542 = vmatpush3.msra.mxu1 %v1827_v35 }
 0x88f   :  { %2543 = vmatprep.subr.mxu1 %v3850_v56 }
 0x890   :  { %2544 = vmatpush3.msra.mxu1 %v1826_v36 }
 0x891   :  { %2545 = vmatprep.subr.mxu1 %v3850_v56 }
 0x892   :  { %2546 = vmatpush3.msra.mxu1 %v1825_v39 }
 0x893   :  { %2547 = vmatprep.subr.mxu1 %v3850_v56 }
 0x894   :  { %2548 = vmatpush3.msra.mxu1 %v1824_v41 }
 0x935   :  { %v1720_v51 = vpop.f32.mrf.mxu1  ;;  %v1791_v53 = vpop.f32.mrf.mxu0 }
 0x936   :  { %v1721_v18 = vadd.f32 %v1720_v51, %v3885_v2  ;;  %v1792_v57 = vadd.f32 %v1791_v53, %v3213_v3  ;;  %v1979_v3 = vld [vmem:[%s3812_s8] ss:$0 sm:$0xff] }
 0x937   :  { %v1722_v40 = vpop.f32.mrf.mxu1  ;;  %v2516_v43 = vpop.f32.mrf.mxu0 }
 0x938   :  { %v1795_v42 = vadd.f32 %v1721_v18, %v1653_v38  ;;  %v1723_v45 = vadd.f32 %v1722_v40, %v3209_v59 }
 0x93a   :  { %v1977_v44 = vmul.f32 -1.442695, %v1795_v42  ;;  %v1805_v37 = vadd.f32 %v1803_v47, %v1723_v45 }
 0x93c   :  { %2637 = vpow2.f32 %v1977_v44  ;;  %v1978_v21 = vmul.f32 -1.442695, %v1805_v37 }
 0x93e   :  { %2639 = vpow2.f32 %v1978_v21 }
 0x949   :  { %v2638_v0 = vpop.eup %2637 }
 0x94a   :  { %v1799_v54 = vadd.f32 1.0, %v2638_v0 }
 0x94b   :  { %v2640_v56 = vpop.eup %2639 }
 0x94c   :  { %2641 = vrcp.f32 %v1799_v54  ;;  %v1809_v10 = vadd.f32 1.0, %v2640_v56 }
 0x94e   :  { %2643 = vrcp.f32 %v1809_v10 }
 0x959   :  { %v2642_v58 = vpop.eup %2641 }
 0x95a   :  { %v1812_v60 = vmul.f32 %v2642_v58, %v1792_v57 }
 0x95b   :  { %v2644_v6 = vpop.eup %2643 }
 0x95c   :  { %v1815_v2 = vadd.f32 %v1813_v12, %v1812_v60  ;;  %v1817_v59 = vsub.f32 1.0, %v2644_v6  ;;  %v1819_v49 = vmul.f32 %v2644_v6, %v3768_v32 }
 0x95e   :  { %2645 = vtanh.f32 %v1815_v2 }
 0x96b   :  { %v2646_v9 = vpop.eup %2645 }
 0x96c   :  { %v1818_v50 = vmul.f32 %v2646_v9, %v1817_v59 }
 0x96e   :  { %v1820_v63 = vadd.f32 %v1819_v49, %v1818_v50 }
 0x970   :  { %1821 = vst [vmem:[#allocation3 + $0x7] sm:$0x1] %v1820_v63  ;;  %1822 = vst [vmem:[#allocation13] sm:$0x1] %v1820_v63 }
 0x977   :  { %v1823_v1 = vld [vmem:[#allocation3] sm:$0xff] }
 0x978   :  { %2550 = vmatmul.mubr.f32.vlgmr.msra.gmra.mxu1 %v1823_v1 }
 0xa38   :  { %v1913_v62 = vpop.f32.mrf.mxu1 }
 0xa39   :  { %v1914_v8 = vadd.f32 %v1979_v3, %v1913_v62 }
 0xa3a   :  { %v2551_v7 = vpop.f32.mrf.mxu1 }
 0xa3b   :  { %v1918_v4 = vsel %vm1917_vm2, %v1914_v8, -1e+30 }
 0xa3c   :  { %1919 = vmax.xlane.f32.xlu0 %v1918_v4 }
 0xac5   :  { %v1920_v61 = vpop.xlane.xlu0 %1919 }
 0xac6   :  { %v1921_v19 = vsub.f32 %v1918_v4, %v1920_v61 }
 0xac8   :  { %v1922_v20 = vmul.f32 1.442695, %v1921_v19 }
 0xaca   :  { %2647 = vpow2.f32 %v1922_v20 }
 0xad7   :  { %v2648_v22 = vpop.eup %2647 }
 0xad8   :  { %1924 = vadd.xlane.f32.xlu1 %v2648_v22 }
 0xad9   :  { %2790 = shalt.err (!%p2787_p10)
}
 0xada   :  { %1949 = dma.vmem_to_hbm [thread:$0]  %s1947_s20, 16, %s3814_s10, [#allocation14]  }
 0xadb   :  { %s2842_s24 = smov [#allocation12]  }
 0xadc   :  { %s1936_s25 = sshll.u32 %s2842_s24, 4  ;;  %s1937_s25 = int_to_ptr.vmem [resolvable:$true] %s1936_s25 }
 0xadd   :  { %s2799_s26 = scalar_lea.vmem %s1937_s25, 128  ;;  %p2804_p12 = scmp.lt.s32.totalorder %s1937_s25, %s1937_s25 }
 0xade   :  { %p2800_p11 = scmp.ne.s32.totalorder %s1937_s25, %s2799_s26  ;;  %p2805_p13 = scmp.lt.s32.totalorder %s2799_s26, %s2799_s26 }
 0xae0   :  { %p2806_p0 = por %p2805_p13, %p2804_p12 }
 0xae2   :  { %p2807_p1 = pnand %p2806_p0, %p2800_p11 }
 0xb61   :  { %v1925_v23 = vpop.xlane.xlu1 %1924 }
 0xb62   :  { %2649 = vlog2.f32 %v1925_v23 }
 0xb6f   :  { %v2650_v24 = vpop.eup %2649 }
 0xb70   :  { %v1927_v25 = vmul.f32 0.6931472, %v2650_v24 }
 0xb72   :  { %v1928_v26 = vsub.f32 %v1921_v19, %v1927_v25 }
 0xb74   :  { %1929 = vst [vmem:[#allocation12] sm:$0xff] %v1928_v26 }
 0xb75   :  { %2810 = shalt.err (!%p2807_p1)
}
 0xb76   :  { %1939 = dma.vmem_to_hbm [thread:$0]  %s1937_s25, 128, %s3813_s9, [#allocation6]  }
 0xb77   :  { %2825 = dma.done.wait [#allocation6], 128  }
 0xb78   :  { %2826 = vsyncadd [#allocation6], 4294967168 }
 0xb79   :  { %2827 = dma.done.wait [#allocation14], 16  }
 0xb7a   :  { %2828 = vsyncadd [#allocation14], 4294967280 }
 0xb7b   :  { %1956 = vsyncpa [#allocation5], 1 }
 0xb7c   :  { %1957 = vsyncpa [#allocation8], 1 }
 0xb7d   :  { %1958 = vsyncpa [#allocation11], 1 }
 0xb7e   :  { %1959 = vsyncpa [#allocation6], 1 }
 0xb7f   :  { %1960 = vsyncpa [#allocation14], 1 }

</bundles_post_ra>
